<compile_context>
chip_gen: v7x
topology: tpu7x:2x2x1
jax: 0.10.0
libtpu: 0.0.40
codegen_flags: <defaults>
</compile_context>

<pallas_src>
import jax
import jax.numpy as jnp
from jax.experimental import pallas as pl
from jax.experimental.pallas import tpu as pltpu

N_HEAD = 4
EPS = 1e-5  # PyTorch nn.LayerNorm default
NEG_INF = -1e30


def clip_layer_kernel(x_ref, mask_ref, ln1_g_ref, ln1_b_ref,
                      wq_ref, bq_ref, wk_ref, bk_ref, wv_ref, bv_ref,
                      wo_ref, bo_ref, ln2_g_ref, ln2_b_ref,
                      w1_ref, b1_ref, w2_ref, b2_ref, out_ref):
    x = x_ref[...]                                   # (Nb, E) rows = (batch-block)*seq
    inv_e = 1.0 / x.shape[-1]

    # ---------- LayerNorm 1 (single-pass moments: both reduces can overlap on XLU) ----------
    mean = jnp.sum(x, axis=-1, keepdims=True) * inv_e
    ex2 = jnp.sum(x * x, axis=-1, keepdims=True) * inv_e
    var = ex2 - mean * mean
    xn = (x - mean) * jax.lax.rsqrt(var + EPS)
    xn = xn * ln1_g_ref[...] + ln1_b_ref[...]

    # ---------- Self-attention (causal, batch-block-diagonal) ----------
    neg_mask = mask_ref[...]                         # (Nb, Nb) additive: 0 / -1e30
    H = wq_ref.shape[0]                              # static
    dn = (((1,), (1,)), ((), ()))                    # contract last dim of both (Q @ K^T, no transpose)

    # Accumulator seeded with residual + out_proj bias: residual-1 and the bias add
    # vanish as separate full-width ops.
    acc = x + bo_ref[...]                            # (Nb, E)
    for h in range(H):                               # static, small head loop
        # per-head projections; weights are pre-stacked (H, E, Dh) so wq_ref[h] is a
        # cheap leading-axis index, not a lane slice of a fused (., 3E) activation.
        qh = jnp.dot(xn, wq_ref[h], preferred_element_type=jnp.float32) + bq_ref[h]   # pre-scaled by 1/sqrt(Dh)
        kh = jnp.dot(xn, wk_ref[h], preferred_element_type=jnp.float32) + bk_ref[h]
        vh = jnp.dot(xn, wv_ref[h], preferred_element_type=jnp.float32) + bv_ref[h]

        s = jax.lax.dot_general(qh, kh, dimension_numbers=dn,
                                preferred_element_type=jnp.float32)                   # (Nb, Nb)
        s = s + neg_mask
        s = s - jnp.max(s, axis=-1, keepdims=True)
        p = jnp.exp(s)
        denom = jnp.sum(p, axis=-1, keepdims=True)
        # EUP approx reciprocal + one Newton step: divide off the VALU, full f32 accuracy.
        r = pl.reciprocal(denom, approx=True)
        r = r * (2.0 - denom * r)
        p = p * r

        oh = jnp.dot(p, vh, preferred_element_type=jnp.float32)                       # (Nb, Dh)
        acc = acc + jnp.dot(oh, wo_ref[h], preferred_element_type=jnp.float32)        # (Nb, E)

    x1 = acc                                         # residual 1 already folded in

    # ---------- LayerNorm 2 ----------
    m2 = jnp.sum(x1, axis=-1, keepdims=True) * inv_e
    e2 = jnp.sum(x1 * x1, axis=-1, keepdims=True) * inv_e
    v2 = e2 - m2 * m2
    x2 = (x1 - m2) * jax.lax.rsqrt(v2 + EPS)
    x2 = x2 * ln2_g_ref[...] + ln2_b_ref[...]

    # ---------- MLP with QuickGELU ----------
    hdd = jnp.dot(x2, w1_ref[...], preferred_element_type=jnp.float32) + b1_ref[...]
    hdd = hdd * jax.nn.sigmoid(1.702 * hdd)          # sigmoid -> EUP, off the VALU path
    y = jnp.dot(hdd, w2_ref[...], preferred_element_type=jnp.float32) + b2_ref[...]

    out_ref[...] = (x1 + y).astype(out_ref.dtype)    # residual 2


def prepare_params(ln1_g, ln1_b, wqkv, bqkv, wo, bo, ln2_g, ln2_b, w1, b1, w2, b2,
                   *, n_head, seq_len, batch_per_block):
    """One-time host-side parameter prep (NOT in the per-call hot path).

    - splits the fused in_proj into per-head weight stacks (H, E, Dh),
    - folds 1/sqrt(Dh) into the Q weights/bias,
    - stacks the out_proj weight per head as (H, Dh, E),
    - builds the additive causal + batch-block-diagonal mask for a (Bb*S)-row block.
    """
    E = wo.shape[0]
    H = n_head
    Dh = E // H
    scale = 1.0 / jnp.sqrt(jnp.float32(Dh))

    wq, wk, wv = jnp.split(wqkv, 3, axis=1)          # each (E, E)
    bq, bk, bv = jnp.split(bqkv, 3, axis=1)          # each (1, E)

    def stack_w(w):                                  # (E, E) -> (H, E, Dh)
        return jnp.stack([w[:, h * Dh:(h + 1) * Dh] for h in range(H)], axis=0)

    def stack_b(b):                                  # (1, E) -> (H, 1, Dh)
        return jnp.stack([b[:, h * Dh:(h + 1) * Dh] for h in range(H)], axis=0)

    wq_s = stack_w(wq) * scale                       # fold softmax scale into Q
    bq_s = stack_b(bq) * scale
    wk_s, bk_s = stack_w(wk), stack_b(bk)
    wv_s, bv_s = stack_w(wv), stack_b(bv)
    wo_s = jnp.stack([wo[h * Dh:(h + 1) * Dh, :] for h in range(H)], axis=0)  # (H, Dh, E)

    Nb = batch_per_block * seq_len
    idx = jnp.arange(Nb)
    row, col = idx[:, None], idx[None, :]
    allowed = (col <= row) & ((col // seq_len) == (row // seq_len))
    neg_mask = jnp.where(allowed, 0.0, NEG_INF).astype(jnp.float32)

    return (neg_mask, ln1_g, ln1_b, wq_s, bq_s, wk_s, bk_s, wv_s, bv_s,
            wo_s, bo, ln2_g, ln2_b, w1, b1, w2, b2)


def _full_spec(p):
    zeros = (0,) * p.ndim
    return pl.BlockSpec(p.shape, lambda i, _z=zeros: _z)


def clip_layer(x, prepared):
    """x: (B, S, E). `prepared` from prepare_params(); its mask fixes rows-per-step."""
    B, S, E = x.shape
    neg_mask = prepared[0]
    Nb = neg_mask.shape[0]                           # rows per grid step = Bb * S
    Bb = Nb // S
    assert B % Bb == 0, "batch_per_block must divide batch"
    n_steps = B // Bb                                # =1 folds whole batch (v5e/v6e);
                                                     # >=2 gives a parallel axis for v7x's 2 TCs
    x2d = x.reshape(B * S, E)
    in_specs = [pl.BlockSpec((Nb, E), lambda i: (i, 0))] + [_full_spec(p) for p in prepared]
    out = pl.pallas_call(
        clip_layer_kernel,
        out_shape=jax.ShapeDtypeStruct((B * S, E), x.dtype),
        grid=(n_steps,),
        in_specs=in_specs,
        out_specs=pl.BlockSpec((Nb, E), lambda i: (i, 0)),
        compiler_params=pltpu.CompilerParams(dimension_semantics=("parallel",)),
    )(x2d, *prepared)
    return out.reshape(B, S, E)


def reference(x, ln1_g, ln1_b, wqkv, bqkv, wo, bo, ln2_g, ln2_b, w1, b1, w2, b2):
    """Pure-JAX reference mirroring the PyTorch forward (for correctness check)."""
    def ln(z, g, b):
        m = z.mean(-1, keepdims=True)
        v = ((z - m) ** 2).mean(-1, keepdims=True)
        return (z - m) / jnp.sqrt(v + EPS) * g + b

    B, S, E = x.shape
    H, Dh = N_HEAD, E // N_HEAD
    xn = ln(x, ln1_g, ln1_b)
    qkv = xn @ wqkv + bqkv
    q, k, v = jnp.split(qkv, 3, axis=-1)
    q = q.reshape(B, S, H, Dh).transpose(0, 2, 1, 3)
    k = k.reshape(B, S, H, Dh).transpose(0, 2, 1, 3)
    v = v.reshape(B, S, H, Dh).transpose(0, 2, 1, 3)
    s = q @ k.transpose(0, 1, 3, 2)
    mask = jnp.triu(jnp.ones((S, S), bool), 1)
    s = jnp.where(mask, NEG_INF, s) / jnp.sqrt(Dh)
    p = jax.nn.softmax(s, axis=-1)
    o = (p @ v).transpose(0, 2, 1, 3).reshape(B, S, E)
    o = o @ wo + bo
    x1 = x + o
    x2 = ln(x1, ln2_g, ln2_b)
    hdd = x2 @ w1 + b1
    hdd = hdd * jax.nn.sigmoid(1.702 * hdd)
    y = hdd @ w2 + b2
    return x1 + y


if __name__ == "__main__":
    B, S, E = 2, 8, 32          # batch, seq, n_embed ; n_head = 4
    key = jax.random.PRNGKey(0)
    keys = jax.random.split(key, 8)

    x = jax.random.normal(keys[0], (B, S, E), dtype=jnp.float32)

    # Deterministic synthetic parameters (PyTorch shapes, pre-transposed to (in, out)).
    ln1_g = jnp.ones((1, E), jnp.float32)
    ln1_b = jnp.zeros((1, E), jnp.float32)
    wqkv = 0.05 * jax.random.normal(keys[1], (E, 3 * E), jnp.float32)   # in_proj.weight.T
    bqkv = 0.01 * jax.random.normal(keys[2], (1, 3 * E), jnp.float32)
    wo = 0.05 * jax.random.normal(keys[3], (E, E), jnp.float32)         # out_proj.weight.T
    bo = 0.01 * jax.random.normal(keys[4], (1, E), jnp.float32)
    ln2_g = jnp.ones((1, E), jnp.float32)
    ln2_b = jnp.zeros((1, E), jnp.float32)
    w1 = 0.05 * jax.random.normal(keys[5], (E, 4 * E), jnp.float32)     # linear_1.weight.T
    b1 = 0.01 * jax.random.normal(keys[6], (1, 4 * E), jnp.float32)
    w2 = 0.05 * jax.random.normal(keys[7], (4 * E, E), jnp.float32)     # linear_2.weight.T
    b2 = jnp.zeros((1, E), jnp.float32)

    raw = (ln1_g, ln1_b, wqkv, bqkv, wo, bo, ln2_g, ln2_b, w1, b1, w2, b2)

    # Fold the whole batch into one grid step (best on single-TC v5e/v6e).
    # On v7x, use batch_per_block=1 to get grid=(B,) "parallel" across both TensorCores.
    prepared = prepare_params(*raw, n_head=N_HEAD, seq_len=S, batch_per_block=B)

    out = clip_layer(x, prepared)
    out = jax.block_until_ready(out)

    ref = reference(x, *raw)
    assert out.shape == (B, S, E)
    assert jnp.allclose(out, ref, atol=1e-4, rtol=1e-4), \
        f"max err {jnp.max(jnp.abs(out - ref))}"

    print("KERNEL_OK")
</pallas_src>

<mosaic_0001>
module attributes {stable_mosaic.version = 11 : i64} {
  func.func @clip_layer_kernel(%arg0: i32, %arg1: memref<16x32xf32, #tpu.memory_space<vmem>>, %arg2: memref<16x16xf32, #tpu.memory_space<vmem>>, %arg3: memref<1x32xf32, #tpu.memory_space<vmem>>, %arg4: memref<1x32xf32, #tpu.memory_space<vmem>>, %arg5: memref<4x32x8xf32, #tpu.memory_space<vmem>>, %arg6: memref<4x1x8xf32, #tpu.memory_space<vmem>>, %arg7: memref<4x32x8xf32, #tpu.memory_space<vmem>>, %arg8: memref<4x1x8xf32, #tpu.memory_space<vmem>>, %arg9: memref<4x32x8xf32, #tpu.memory_space<vmem>>, %arg10: memref<4x1x8xf32, #tpu.memory_space<vmem>>, %arg11: memref<4x8x32xf32, #tpu.memory_space<vmem>>, %arg12: memref<1x32xf32, #tpu.memory_space<vmem>>, %arg13: memref<1x32xf32, #tpu.memory_space<vmem>>, %arg14: memref<1x32xf32, #tpu.memory_space<vmem>>, %arg15: memref<32x128xf32, #tpu.memory_space<vmem>>, %arg16: memref<1x128xf32, #tpu.memory_space<vmem>>, %arg17: memref<128x32xf32, #tpu.memory_space<vmem>>, %arg18: memref<1x32xf32, #tpu.memory_space<vmem>>, %arg19: memref<16x32xf32, #tpu.memory_space<vmem>>) attributes {dimension_semantics = [#tpu.dimension_semantics<parallel>], iteration_bounds = array<i64: 1>, scalar_prefetch = 0 : i64, scratch_operands = 0 : i64, tpu.core_type = #tpu.core_type<tc>, window_params = [{transform_indices = @transform_0, window_bounds = array<i64: 16, 32>}, {pipeline_mode = #tpu.pipeline_mode<synchronous>, transform_indices = @transform_1, window_bounds = array<i64: 16, 16>}, {pipeline_mode = #tpu.pipeline_mode<synchronous>, transform_indices = @transform_2, window_bounds = array<i64: 1, 32>}, {pipeline_mode = #tpu.pipeline_mode<synchronous>, transform_indices = @transform_3, window_bounds = array<i64: 1, 32>}, {pipeline_mode = #tpu.pipeline_mode<synchronous>, transform_indices = @transform_4, window_bounds = array<i64: 4, 32, 8>}, {pipeline_mode = #tpu.pipeline_mode<synchronous>, transform_indices = @transform_5, window_bounds = array<i64: 4, 1, 8>}, {pipeline_mode = #tpu.pipeline_mode<synchronous>, transform_indices = @transform_6, window_bounds = array<i64: 4, 32, 8>}, {pipeline_mode = #tpu.pipeline_mode<synchronous>, transform_indices = @transform_7, window_bounds = array<i64: 4, 1, 8>}, {pipeline_mode = #tpu.pipeline_mode<synchronous>, transform_indices = @transform_8, window_bounds = array<i64: 4, 32, 8>}, {pipeline_mode = #tpu.pipeline_mode<synchronous>, transform_indices = @transform_9, window_bounds = array<i64: 4, 1, 8>}, {pipeline_mode = #tpu.pipeline_mode<synchronous>, transform_indices = @transform_10, window_bounds = array<i64: 4, 8, 32>}, {pipeline_mode = #tpu.pipeline_mode<synchronous>, transform_indices = @transform_11, window_bounds = array<i64: 1, 32>}, {pipeline_mode = #tpu.pipeline_mode<synchronous>, transform_indices = @transform_12, window_bounds = array<i64: 1, 32>}, {pipeline_mode = #tpu.pipeline_mode<synchronous>, transform_indices = @transform_13, window_bounds = array<i64: 1, 32>}, {pipeline_mode = #tpu.pipeline_mode<synchronous>, transform_indices = @transform_14, window_bounds = array<i64: 32, 128>}, {pipeline_mode = #tpu.pipeline_mode<synchronous>, transform_indices = @transform_15, window_bounds = array<i64: 1, 128>}, {pipeline_mode = #tpu.pipeline_mode<synchronous>, transform_indices = @transform_16, window_bounds = array<i64: 128, 32>}, {pipeline_mode = #tpu.pipeline_mode<synchronous>, transform_indices = @transform_17, window_bounds = array<i64: 1, 32>}, {transform_indices = @transform_18, window_bounds = array<i64: 16, 32>}]} {
    %c0 = arith.constant 0 : index
    %c0_0 = arith.constant 0 : index
    %0 = vector.load %arg1[%c0, %c0_0] : memref<16x32xf32, #tpu.memory_space<vmem>>, vector<16x32xf32>
    %cst = arith.constant dense<0.000000e+00> : vector<16xf32>
    %1 = vector.multi_reduction <add>, %0, %cst [1] : vector<16x32xf32> to vector<16xf32>
    %2 = vector.shape_cast %1 : vector<16xf32> to vector<16x1xf32>
    %cst_1 = arith.constant 3.125000e-02 : f32
    %3 = vector.broadcast %cst_1 : f32 to vector<16x1xf32>
    %4 = arith.mulf %2, %3 : vector<16x1xf32>
    %5 = arith.mulf %0, %0 : vector<16x32xf32>
    %cst_2 = arith.constant dense<0.000000e+00> : vector<16xf32>
    %6 = vector.multi_reduction <add>, %5, %cst_2 [1] : vector<16x32xf32> to vector<16xf32>
    %7 = vector.shape_cast %6 : vector<16xf32> to vector<16x1xf32>
    %cst_3 = arith.constant 3.125000e-02 : f32
    %8 = vector.broadcast %cst_3 : f32 to vector<16x1xf32>
    %9 = arith.mulf %7, %8 : vector<16x1xf32>
    %10 = arith.mulf %4, %4 : vector<16x1xf32>
    %11 = arith.subf %9, %10 : vector<16x1xf32>
    %12 = vector.broadcast %4 : vector<16x1xf32> to vector<16x32xf32>
    %13 = arith.subf %0, %12 : vector<16x32xf32>
    %cst_4 = arith.constant 9.99999974E-6 : f32
    %14 = vector.broadcast %cst_4 : f32 to vector<16x1xf32>
    %15 = arith.addf %11, %14 : vector<16x1xf32>
    %16 = math.rsqrt %15 : vector<16x1xf32>
    %17 = vector.broadcast %16 : vector<16x1xf32> to vector<16x32xf32>
    %18 = arith.mulf %13, %17 : vector<16x32xf32>
    %c0_5 = arith.constant 0 : index
    %c0_6 = arith.constant 0 : index
    %19 = vector.load %arg3[%c0_5, %c0_6] : memref<1x32xf32, #tpu.memory_space<vmem>>, vector<1x32xf32>
    %20 = vector.broadcast %19 : vector<1x32xf32> to vector<16x32xf32>
    %21 = arith.mulf %18, %20 : vector<16x32xf32>
    %c0_7 = arith.constant 0 : index
    %c0_8 = arith.constant 0 : index
    %22 = vector.load %arg4[%c0_7, %c0_8] : memref<1x32xf32, #tpu.memory_space<vmem>>, vector<1x32xf32>
    %23 = vector.broadcast %22 : vector<1x32xf32> to vector<16x32xf32>
    %24 = arith.addf %21, %23 : vector<16x32xf32>
    %c0_9 = arith.constant 0 : index
    %c0_10 = arith.constant 0 : index
    %25 = vector.load %arg2[%c0_9, %c0_10] : memref<16x16xf32, #tpu.memory_space<vmem>>, vector<16x16xf32>
    %c0_11 = arith.constant 0 : index
    %c0_12 = arith.constant 0 : index
    %26 = vector.load %arg12[%c0_11, %c0_12] : memref<1x32xf32, #tpu.memory_space<vmem>>, vector<1x32xf32>
    %27 = vector.broadcast %26 : vector<1x32xf32> to vector<16x32xf32>
    %28 = arith.addf %0, %27 : vector<16x32xf32>
    %c0_13 = arith.constant 0 : index
    %c0_14 = arith.constant 0 : index
    %c0_15 = arith.constant 0 : index
    %29 = vector.load %arg5[%c0_13, %c0_14, %c0_15] : memref<4x32x8xf32, #tpu.memory_space<vmem>>, vector<1x32x8xf32>
    %30 = vector.shape_cast %29 : vector<1x32x8xf32> to vector<32x8xf32>
    %cst_16 = arith.constant dense<0.000000e+00> : vector<16x8xf32>
    %31 = tpu.matmul %24, %30, %cst_16 {dimension_numbers = #tpu.dot_dimension_numbers<[1], [0], [0], [1], [0, 0, 1, 1], [], []>} : vector<16x32xf32>, vector<32x8xf32>, vector<16x8xf32> -> vector<16x8xf32>
    %c0_17 = arith.constant 0 : index
    %c0_18 = arith.constant 0 : index
    %c0_19 = arith.constant 0 : index
    %32 = vector.load %arg6[%c0_17, %c0_18, %c0_19] : memref<4x1x8xf32, #tpu.memory_space<vmem>>, vector<1x1x8xf32>
    %33 = vector.shape_cast %32 : vector<1x1x8xf32> to vector<1x8xf32>
    %34 = vector.broadcast %33 : vector<1x8xf32> to vector<16x8xf32>
    %35 = arith.addf %31, %34 : vector<16x8xf32>
    %c0_20 = arith.constant 0 : index
    %c0_21 = arith.constant 0 : index
    %c0_22 = arith.constant 0 : index
    %36 = vector.load %arg7[%c0_20, %c0_21, %c0_22] : memref<4x32x8xf32, #tpu.memory_space<vmem>>, vector<1x32x8xf32>
    %37 = vector.shape_cast %36 : vector<1x32x8xf32> to vector<32x8xf32>
    %cst_23 = arith.constant dense<0.000000e+00> : vector<16x8xf32>
    %38 = tpu.matmul %24, %37, %cst_23 {dimension_numbers = #tpu.dot_dimension_numbers<[1], [0], [0], [1], [0, 0, 1, 1], [], []>} : vector<16x32xf32>, vector<32x8xf32>, vector<16x8xf32> -> vector<16x8xf32>
    %c0_24 = arith.constant 0 : index
    %c0_25 = arith.constant 0 : index
    %c0_26 = arith.constant 0 : index
    %39 = vector.load %arg8[%c0_24, %c0_25, %c0_26] : memref<4x1x8xf32, #tpu.memory_space<vmem>>, vector<1x1x8xf32>
    %40 = vector.shape_cast %39 : vector<1x1x8xf32> to vector<1x8xf32>
    %41 = vector.broadcast %40 : vector<1x8xf32> to vector<16x8xf32>
    %42 = arith.addf %38, %41 : vector<16x8xf32>
    %c0_27 = arith.constant 0 : index
    %c0_28 = arith.constant 0 : index
    %c0_29 = arith.constant 0 : index
    %43 = vector.load %arg9[%c0_27, %c0_28, %c0_29] : memref<4x32x8xf32, #tpu.memory_space<vmem>>, vector<1x32x8xf32>
    %44 = vector.shape_cast %43 : vector<1x32x8xf32> to vector<32x8xf32>
    %cst_30 = arith.constant dense<0.000000e+00> : vector<16x8xf32>
    %45 = tpu.matmul %24, %44, %cst_30 {dimension_numbers = #tpu.dot_dimension_numbers<[1], [0], [0], [1], [0, 0, 1, 1], [], []>} : vector<16x32xf32>, vector<32x8xf32>, vector<16x8xf32> -> vector<16x8xf32>
    %c0_31 = arith.constant 0 : index
    %c0_32 = arith.constant 0 : index
    %c0_33 = arith.constant 0 : index
    %46 = vector.load %arg10[%c0_31, %c0_32, %c0_33] : memref<4x1x8xf32, #tpu.memory_space<vmem>>, vector<1x1x8xf32>
    %47 = vector.shape_cast %46 : vector<1x1x8xf32> to vector<1x8xf32>
    %48 = vector.broadcast %47 : vector<1x8xf32> to vector<16x8xf32>
    %49 = arith.addf %45, %48 : vector<16x8xf32>
    %cst_34 = arith.constant dense<0.000000e+00> : vector<16x16xf32>
    %50 = tpu.matmul %35, %42, %cst_34 {dimension_numbers = #tpu.dot_dimension_numbers<[1], [1], [0], [0], [0, 0, 1, 0], [], []>} : vector<16x8xf32>, vector<16x8xf32>, vector<16x16xf32> -> vector<16x16xf32>
    %51 = arith.addf %50, %25 : vector<16x16xf32>
    %cst_35 = arith.constant dense<0xFF800000> : vector<16xf32>
    %52 = vector.multi_reduction <maximumf>, %51, %cst_35 [1] : vector<16x16xf32> to vector<16xf32>
    %53 = vector.shape_cast %52 : vector<16xf32> to vector<16x1xf32>
    %54 = vector.broadcast %53 : vector<16x1xf32> to vector<16x16xf32>
    %55 = arith.subf %51, %54 : vector<16x16xf32>
    %56 = math.exp %55 : vector<16x16xf32>
    %cst_36 = arith.constant dense<0.000000e+00> : vector<16xf32>
    %57 = vector.multi_reduction <add>, %56, %cst_36 [1] : vector<16x16xf32> to vector<16xf32>
    %58 = vector.shape_cast %57 : vector<16xf32> to vector<16x1xf32>
    %59 = tpu.reciprocal %58 {approx = true} : vector<16x1xf32> -> vector<16x1xf32>
    %60 = arith.mulf %58, %59 : vector<16x1xf32>
    %cst_37 = arith.constant 2.000000e+00 : f32
    %61 = vector.broadcast %cst_37 : f32 to vector<16x1xf32>
    %62 = arith.subf %61, %60 : vector<16x1xf32>
    %63 = arith.mulf %59, %62 : vector<16x1xf32>
    %64 = vector.broadcast %63 : vector<16x1xf32> to vector<16x16xf32>
    %65 = arith.mulf %56, %64 : vector<16x16xf32>
    %cst_38 = arith.constant dense<0.000000e+00> : vector<16x8xf32>
    %66 = tpu.matmul %65, %49, %cst_38 {dimension_numbers = #tpu.dot_dimension_numbers<[1], [0], [0], [1], [0, 0, 1, 1], [], []>} : vector<16x16xf32>, vector<16x8xf32>, vector<16x8xf32> -> vector<16x8xf32>
    %c0_39 = arith.constant 0 : index
    %c0_40 = arith.constant 0 : index
    %c0_41 = arith.constant 0 : index
    %67 = vector.load %arg11[%c0_39, %c0_40, %c0_41] : memref<4x8x32xf32, #tpu.memory_space<vmem>>, vector<1x8x32xf32>
    %68 = vector.shape_cast %67 : vector<1x8x32xf32> to vector<8x32xf32>
    %cst_42 = arith.constant dense<0.000000e+00> : vector<16x32xf32>
    %69 = tpu.matmul %66, %68, %cst_42 {dimension_numbers = #tpu.dot_dimension_numbers<[1], [0], [0], [1], [0, 0, 1, 1], [], []>} : vector<16x8xf32>, vector<8x32xf32>, vector<16x32xf32> -> vector<16x32xf32>
    %70 = arith.addf %28, %69 : vector<16x32xf32>
    %c1 = arith.constant 1 : index
    %c0_43 = arith.constant 0 : index
    %c0_44 = arith.constant 0 : index
    %71 = vector.load %arg5[%c1, %c0_43, %c0_44] : memref<4x32x8xf32, #tpu.memory_space<vmem>>, vector<1x32x8xf32>
    %72 = vector.shape_cast %71 : vector<1x32x8xf32> to vector<32x8xf32>
    %cst_45 = arith.constant dense<0.000000e+00> : vector<16x8xf32>
    %73 = tpu.matmul %24, %72, %cst_45 {dimension_numbers = #tpu.dot_dimension_numbers<[1], [0], [0], [1], [0, 0, 1, 1], [], []>} : vector<16x32xf32>, vector<32x8xf32>, vector<16x8xf32> -> vector<16x8xf32>
    %c1_46 = arith.constant 1 : index
    %c0_47 = arith.constant 0 : index
    %c0_48 = arith.constant 0 : index
    %74 = vector.load %arg6[%c1_46, %c0_47, %c0_48] : memref<4x1x8xf32, #tpu.memory_space<vmem>>, vector<1x1x8xf32>
    %75 = vector.shape_cast %74 : vector<1x1x8xf32> to vector<1x8xf32>
    %76 = vector.broadcast %75 : vector<1x8xf32> to vector<16x8xf32>
    %77 = arith.addf %73, %76 : vector<16x8xf32>
    %c1_49 = arith.constant 1 : index
    %c0_50 = arith.constant 0 : index
    %c0_51 = arith.constant 0 : index
    %78 = vector.load %arg7[%c1_49, %c0_50, %c0_51] : memref<4x32x8xf32, #tpu.memory_space<vmem>>, vector<1x32x8xf32>
    %79 = vector.shape_cast %78 : vector<1x32x8xf32> to vector<32x8xf32>
    %cst_52 = arith.constant dense<0.000000e+00> : vector<16x8xf32>
    %80 = tpu.matmul %24, %79, %cst_52 {dimension_numbers = #tpu.dot_dimension_numbers<[1], [0], [0], [1], [0, 0, 1, 1], [], []>} : vector<16x32xf32>, vector<32x8xf32>, vector<16x8xf32> -> vector<16x8xf32>
    %c1_53 = arith.constant 1 : index
    %c0_54 = arith.constant 0 : index
    %c0_55 = arith.constant 0 : index
    %81 = vector.load %arg8[%c1_53, %c0_54, %c0_55] : memref<4x1x8xf32, #tpu.memory_space<vmem>>, vector<1x1x8xf32>
    %82 = vector.shape_cast %81 : vector<1x1x8xf32> to vector<1x8xf32>
    %83 = vector.broadcast %82 : vector<1x8xf32> to vector<16x8xf32>
    %84 = arith.addf %80, %83 : vector<16x8xf32>
    %c1_56 = arith.constant 1 : index
    %c0_57 = arith.constant 0 : index
    %c0_58 = arith.constant 0 : index
    %85 = vector.load %arg9[%c1_56, %c0_57, %c0_58] : memref<4x32x8xf32, #tpu.memory_space<vmem>>, vector<1x32x8xf32>
    %86 = vector.shape_cast %85 : vector<1x32x8xf32> to vector<32x8xf32>
    %cst_59 = arith.constant dense<0.000000e+00> : vector<16x8xf32>
    %87 = tpu.matmul %24, %86, %cst_59 {dimension_numbers = #tpu.dot_dimension_numbers<[1], [0], [0], [1], [0, 0, 1, 1], [], []>} : vector<16x32xf32>, vector<32x8xf32>, vector<16x8xf32> -> vector<16x8xf32>
    %c1_60 = arith.constant 1 : index
    %c0_61 = arith.constant 0 : index
    %c0_62 = arith.constant 0 : index
    %88 = vector.load %arg10[%c1_60, %c0_61, %c0_62] : memref<4x1x8xf32, #tpu.memory_space<vmem>>, vector<1x1x8xf32>
    %89 = vector.shape_cast %88 : vector<1x1x8xf32> to vector<1x8xf32>
    %90 = vector.broadcast %89 : vector<1x8xf32> to vector<16x8xf32>
    %91 = arith.addf %87, %90 : vector<16x8xf32>
    %cst_63 = arith.constant dense<0.000000e+00> : vector<16x16xf32>
    %92 = tpu.matmul %77, %84, %cst_63 {dimension_numbers = #tpu.dot_dimension_numbers<[1], [1], [0], [0], [0, 0, 1, 0], [], []>} : vector<16x8xf32>, vector<16x8xf32>, vector<16x16xf32> -> vector<16x16xf32>
    %93 = arith.addf %92, %25 : vector<16x16xf32>
    %cst_64 = arith.constant dense<0xFF800000> : vector<16xf32>
    %94 = vector.multi_reduction <maximumf>, %93, %cst_64 [1] : vector<16x16xf32> to vector<16xf32>
    %95 = vector.shape_cast %94 : vector<16xf32> to vector<16x1xf32>
    %96 = vector.broadcast %95 : vector<16x1xf32> to vector<16x16xf32>
    %97 = arith.subf %93, %96 : vector<16x16xf32>
    %98 = math.exp %97 : vector<16x16xf32>
    %cst_65 = arith.constant dense<0.000000e+00> : vector<16xf32>
    %99 = vector.multi_reduction <add>, %98, %cst_65 [1] : vector<16x16xf32> to vector<16xf32>
    %100 = vector.shape_cast %99 : vector<16xf32> to vector<16x1xf32>
    %101 = tpu.reciprocal %100 {approx = true} : vector<16x1xf32> -> vector<16x1xf32>
    %102 = arith.mulf %100, %101 : vector<16x1xf32>
    %cst_66 = arith.constant 2.000000e+00 : f32
    %103 = vector.broadcast %cst_66 : f32 to vector<16x1xf32>
    %104 = arith.subf %103, %102 : vector<16x1xf32>
    %105 = arith.mulf %101, %104 : vector<16x1xf32>
    %106 = vector.broadcast %105 : vector<16x1xf32> to vector<16x16xf32>
    %107 = arith.mulf %98, %106 : vector<16x16xf32>
    %cst_67 = arith.constant dense<0.000000e+00> : vector<16x8xf32>
    %108 = tpu.matmul %107, %91, %cst_67 {dimension_numbers = #tpu.dot_dimension_numbers<[1], [0], [0], [1], [0, 0, 1, 1], [], []>} : vector<16x16xf32>, vector<16x8xf32>, vector<16x8xf32> -> vector<16x8xf32>
    %c1_68 = arith.constant 1 : index
    %c0_69 = arith.constant 0 : index
    %c0_70 = arith.constant 0 : index
    %109 = vector.load %arg11[%c1_68, %c0_69, %c0_70] : memref<4x8x32xf32, #tpu.memory_space<vmem>>, vector<1x8x32xf32>
    %110 = vector.shape_cast %109 : vector<1x8x32xf32> to vector<8x32xf32>
    %cst_71 = arith.constant dense<0.000000e+00> : vector<16x32xf32>
    %111 = tpu.matmul %108, %110, %cst_71 {dimension_numbers = #tpu.dot_dimension_numbers<[1], [0], [0], [1], [0, 0, 1, 1], [], []>} : vector<16x8xf32>, vector<8x32xf32>, vector<16x32xf32> -> vector<16x32xf32>
    %112 = arith.addf %70, %111 : vector<16x32xf32>
    %c2 = arith.constant 2 : index
    %c0_72 = arith.constant 0 : index
    %c0_73 = arith.constant 0 : index
    %113 = vector.load %arg5[%c2, %c0_72, %c0_73] : memref<4x32x8xf32, #tpu.memory_space<vmem>>, vector<1x32x8xf32>
    %114 = vector.shape_cast %113 : vector<1x32x8xf32> to vector<32x8xf32>
    %cst_74 = arith.constant dense<0.000000e+00> : vector<16x8xf32>
    %115 = tpu.matmul %24, %114, %cst_74 {dimension_numbers = #tpu.dot_dimension_numbers<[1], [0], [0], [1], [0, 0, 1, 1], [], []>} : vector<16x32xf32>, vector<32x8xf32>, vector<16x8xf32> -> vector<16x8xf32>
    %c2_75 = arith.constant 2 : index
    %c0_76 = arith.constant 0 : index
    %c0_77 = arith.constant 0 : index
    %116 = vector.load %arg6[%c2_75, %c0_76, %c0_77] : memref<4x1x8xf32, #tpu.memory_space<vmem>>, vector<1x1x8xf32>
    %117 = vector.shape_cast %116 : vector<1x1x8xf32> to vector<1x8xf32>
    %118 = vector.broadcast %117 : vector<1x8xf32> to vector<16x8xf32>
    %119 = arith.addf %115, %118 : vector<16x8xf32>
    %c2_78 = arith.constant 2 : index
    %c0_79 = arith.constant 0 : index
    %c0_80 = arith.constant 0 : index
    %120 = vector.load %arg7[%c2_78, %c0_79, %c0_80] : memref<4x32x8xf32, #tpu.memory_space<vmem>>, vector<1x32x8xf32>
    %121 = vector.shape_cast %120 : vector<1x32x8xf32> to vector<32x8xf32>
    %cst_81 = arith.constant dense<0.000000e+00> : vector<16x8xf32>
    %122 = tpu.matmul %24, %121, %cst_81 {dimension_numbers = #tpu.dot_dimension_numbers<[1], [0], [0], [1], [0, 0, 1, 1], [], []>} : vector<16x32xf32>, vector<32x8xf32>, vector<16x8xf32> -> vector<16x8xf32>
    %c2_82 = arith.constant 2 : index
    %c0_83 = arith.constant 0 : index
    %c0_84 = arith.constant 0 : index
    %123 = vector.load %arg8[%c2_82, %c0_83, %c0_84] : memref<4x1x8xf32, #tpu.memory_space<vmem>>, vector<1x1x8xf32>
    %124 = vector.shape_cast %123 : vector<1x1x8xf32> to vector<1x8xf32>
    %125 = vector.broadcast %124 : vector<1x8xf32> to vector<16x8xf32>
    %126 = arith.addf %122, %125 : vector<16x8xf32>
    %c2_85 = arith.constant 2 : index
    %c0_86 = arith.constant 0 : index
    %c0_87 = arith.constant 0 : index
    %127 = vector.load %arg9[%c2_85, %c0_86, %c0_87] : memref<4x32x8xf32, #tpu.memory_space<vmem>>, vector<1x32x8xf32>
    %128 = vector.shape_cast %127 : vector<1x32x8xf32> to vector<32x8xf32>
    %cst_88 = arith.constant dense<0.000000e+00> : vector<16x8xf32>
    %129 = tpu.matmul %24, %128, %cst_88 {dimension_numbers = #tpu.dot_dimension_numbers<[1], [0], [0], [1], [0, 0, 1, 1], [], []>} : vector<16x32xf32>, vector<32x8xf32>, vector<16x8xf32> -> vector<16x8xf32>
    %c2_89 = arith.constant 2 : index
    %c0_90 = arith.constant 0 : index
    %c0_91 = arith.constant 0 : index
    %130 = vector.load %arg10[%c2_89, %c0_90, %c0_91] : memref<4x1x8xf32, #tpu.memory_space<vmem>>, vector<1x1x8xf32>
    %131 = vector.shape_cast %130 : vector<1x1x8xf32> to vector<1x8xf32>
    %132 = vector.broadcast %131 : vector<1x8xf32> to vector<16x8xf32>
    %133 = arith.addf %129, %132 : vector<16x8xf32>
    %cst_92 = arith.constant dense<0.000000e+00> : vector<16x16xf32>
    %134 = tpu.matmul %119, %126, %cst_92 {dimension_numbers = #tpu.dot_dimension_numbers<[1], [1], [0], [0], [0, 0, 1, 0], [], []>} : vector<16x8xf32>, vector<16x8xf32>, vector<16x16xf32> -> vector<16x16xf32>
    %135 = arith.addf %134, %25 : vector<16x16xf32>
    %cst_93 = arith.constant dense<0xFF800000> : vector<16xf32>
    %136 = vector.multi_reduction <maximumf>, %135, %cst_93 [1] : vector<16x16xf32> to vector<16xf32>
    %137 = vector.shape_cast %136 : vector<16xf32> to vector<16x1xf32>
    %138 = vector.broadcast %137 : vector<16x1xf32> to vector<16x16xf32>
    %139 = arith.subf %135, %138 : vector<16x16xf32>
    %140 = math.exp %139 : vector<16x16xf32>
    %cst_94 = arith.constant dense<0.000000e+00> : vector<16xf32>
    %141 = vector.multi_reduction <add>, %140, %cst_94 [1] : vector<16x16xf32> to vector<16xf32>
    %142 = vector.shape_cast %141 : vector<16xf32> to vector<16x1xf32>
    %143 = tpu.reciprocal %142 {approx = true} : vector<16x1xf32> -> vector<16x1xf32>
    %144 = arith.mulf %142, %143 : vector<16x1xf32>
    %cst_95 = arith.constant 2.000000e+00 : f32
    %145 = vector.broadcast %cst_95 : f32 to vector<16x1xf32>
    %146 = arith.subf %145, %144 : vector<16x1xf32>
    %147 = arith.mulf %143, %146 : vector<16x1xf32>
    %148 = vector.broadcast %147 : vector<16x1xf32> to vector<16x16xf32>
    %149 = arith.mulf %140, %148 : vector<16x16xf32>
    %cst_96 = arith.constant dense<0.000000e+00> : vector<16x8xf32>
    %150 = tpu.matmul %149, %133, %cst_96 {dimension_numbers = #tpu.dot_dimension_numbers<[1], [0], [0], [1], [0, 0, 1, 1], [], []>} : vector<16x16xf32>, vector<16x8xf32>, vector<16x8xf32> -> vector<16x8xf32>
    %c2_97 = arith.constant 2 : index
    %c0_98 = arith.constant 0 : index
    %c0_99 = arith.constant 0 : index
    %151 = vector.load %arg11[%c2_97, %c0_98, %c0_99] : memref<4x8x32xf32, #tpu.memory_space<vmem>>, vector<1x8x32xf32>
    %152 = vector.shape_cast %151 : vector<1x8x32xf32> to vector<8x32xf32>
    %cst_100 = arith.constant dense<0.000000e+00> : vector<16x32xf32>
    %153 = tpu.matmul %150, %152, %cst_100 {dimension_numbers = #tpu.dot_dimension_numbers<[1], [0], [0], [1], [0, 0, 1, 1], [], []>} : vector<16x8xf32>, vector<8x32xf32>, vector<16x32xf32> -> vector<16x32xf32>
    %154 = arith.addf %112, %153 : vector<16x32xf32>
    %c3 = arith.constant 3 : index
    %c0_101 = arith.constant 0 : index
    %c0_102 = arith.constant 0 : index
    %155 = vector.load %arg5[%c3, %c0_101, %c0_102] : memref<4x32x8xf32, #tpu.memory_space<vmem>>, vector<1x32x8xf32>
    %156 = vector.shape_cast %155 : vector<1x32x8xf32> to vector<32x8xf32>
    %cst_103 = arith.constant dense<0.000000e+00> : vector<16x8xf32>
    %157 = tpu.matmul %24, %156, %cst_103 {dimension_numbers = #tpu.dot_dimension_numbers<[1], [0], [0], [1], [0, 0, 1, 1], [], []>} : vector<16x32xf32>, vector<32x8xf32>, vector<16x8xf32> -> vector<16x8xf32>
    %c3_104 = arith.constant 3 : index
    %c0_105 = arith.constant 0 : index
    %c0_106 = arith.constant 0 : index
    %158 = vector.load %arg6[%c3_104, %c0_105, %c0_106] : memref<4x1x8xf32, #tpu.memory_space<vmem>>, vector<1x1x8xf32>
    %159 = vector.shape_cast %158 : vector<1x1x8xf32> to vector<1x8xf32>
    %160 = vector.broadcast %159 : vector<1x8xf32> to vector<16x8xf32>
    %161 = arith.addf %157, %160 : vector<16x8xf32>
    %c3_107 = arith.constant 3 : index
    %c0_108 = arith.constant 0 : index
    %c0_109 = arith.constant 0 : index
    %162 = vector.load %arg7[%c3_107, %c0_108, %c0_109] : memref<4x32x8xf32, #tpu.memory_space<vmem>>, vector<1x32x8xf32>
    %163 = vector.shape_cast %162 : vector<1x32x8xf32> to vector<32x8xf32>
    %cst_110 = arith.constant dense<0.000000e+00> : vector<16x8xf32>
    %164 = tpu.matmul %24, %163, %cst_110 {dimension_numbers = #tpu.dot_dimension_numbers<[1], [0], [0], [1], [0, 0, 1, 1], [], []>} : vector<16x32xf32>, vector<32x8xf32>, vector<16x8xf32> -> vector<16x8xf32>
    %c3_111 = arith.constant 3 : index
    %c0_112 = arith.constant 0 : index
    %c0_113 = arith.constant 0 : index
    %165 = vector.load %arg8[%c3_111, %c0_112, %c0_113] : memref<4x1x8xf32, #tpu.memory_space<vmem>>, vector<1x1x8xf32>
    %166 = vector.shape_cast %165 : vector<1x1x8xf32> to vector<1x8xf32>
    %167 = vector.broadcast %166 : vector<1x8xf32> to vector<16x8xf32>
    %168 = arith.addf %164, %167 : vector<16x8xf32>
    %c3_114 = arith.constant 3 : index
    %c0_115 = arith.constant 0 : index
    %c0_116 = arith.constant 0 : index
    %169 = vector.load %arg9[%c3_114, %c0_115, %c0_116] : memref<4x32x8xf32, #tpu.memory_space<vmem>>, vector<1x32x8xf32>
    %170 = vector.shape_cast %169 : vector<1x32x8xf32> to vector<32x8xf32>
    %cst_117 = arith.constant dense<0.000000e+00> : vector<16x8xf32>
    %171 = tpu.matmul %24, %170, %cst_117 {dimension_numbers = #tpu.dot_dimension_numbers<[1], [0], [0], [1], [0, 0, 1, 1], [], []>} : vector<16x32xf32>, vector<32x8xf32>, vector<16x8xf32> -> vector<16x8xf32>
    %c3_118 = arith.constant 3 : index
    %c0_119 = arith.constant 0 : index
    %c0_120 = arith.constant 0 : index
    %172 = vector.load %arg10[%c3_118, %c0_119, %c0_120] : memref<4x1x8xf32, #tpu.memory_space<vmem>>, vector<1x1x8xf32>
    %173 = vector.shape_cast %172 : vector<1x1x8xf32> to vector<1x8xf32>
    %174 = vector.broadcast %173 : vector<1x8xf32> to vector<16x8xf32>
    %175 = arith.addf %171, %174 : vector<16x8xf32>
    %cst_121 = arith.constant dense<0.000000e+00> : vector<16x16xf32>
    %176 = tpu.matmul %161, %168, %cst_121 {dimension_numbers = #tpu.dot_dimension_numbers<[1], [1], [0], [0], [0, 0, 1, 0], [], []>} : vector<16x8xf32>, vector<16x8xf32>, vector<16x16xf32> -> vector<16x16xf32>
    %177 = arith.addf %176, %25 : vector<16x16xf32>
    %cst_122 = arith.constant dense<0xFF800000> : vector<16xf32>
    %178 = vector.multi_reduction <maximumf>, %177, %cst_122 [1] : vector<16x16xf32> to vector<16xf32>
    %179 = vector.shape_cast %178 : vector<16xf32> to vector<16x1xf32>
    %180 = vector.broadcast %179 : vector<16x1xf32> to vector<16x16xf32>
    %181 = arith.subf %177, %180 : vector<16x16xf32>
    %182 = math.exp %181 : vector<16x16xf32>
    %cst_123 = arith.constant dense<0.000000e+00> : vector<16xf32>
    %183 = vector.multi_reduction <add>, %182, %cst_123 [1] : vector<16x16xf32> to vector<16xf32>
    %184 = vector.shape_cast %183 : vector<16xf32> to vector<16x1xf32>
    %185 = tpu.reciprocal %184 {approx = true} : vector<16x1xf32> -> vector<16x1xf32>
    %186 = arith.mulf %184, %185 : vector<16x1xf32>
    %cst_124 = arith.constant 2.000000e+00 : f32
    %187 = vector.broadcast %cst_124 : f32 to vector<16x1xf32>
    %188 = arith.subf %187, %186 : vector<16x1xf32>
    %189 = arith.mulf %185, %188 : vector<16x1xf32>
    %190 = vector.broadcast %189 : vector<16x1xf32> to vector<16x16xf32>
    %191 = arith.mulf %182, %190 : vector<16x16xf32>
    %cst_125 = arith.constant dense<0.000000e+00> : vector<16x8xf32>
    %192 = tpu.matmul %191, %175, %cst_125 {dimension_numbers = #tpu.dot_dimension_numbers<[1], [0], [0], [1], [0, 0, 1, 1], [], []>} : vector<16x16xf32>, vector<16x8xf32>, vector<16x8xf32> -> vector<16x8xf32>
    %c3_126 = arith.constant 3 : index
    %c0_127 = arith.constant 0 : index
    %c0_128 = arith.constant 0 : index
    %193 = vector.load %arg11[%c3_126, %c0_127, %c0_128] : memref<4x8x32xf32, #tpu.memory_space<vmem>>, vector<1x8x32xf32>
    %194 = vector.shape_cast %193 : vector<1x8x32xf32> to vector<8x32xf32>
    %cst_129 = arith.constant dense<0.000000e+00> : vector<16x32xf32>
    %195 = tpu.matmul %192, %194, %cst_129 {dimension_numbers = #tpu.dot_dimension_numbers<[1], [0], [0], [1], [0, 0, 1, 1], [], []>} : vector<16x8xf32>, vector<8x32xf32>, vector<16x32xf32> -> vector<16x32xf32>
    %196 = arith.addf %154, %195 : vector<16x32xf32>
    %cst_130 = arith.constant dense<0.000000e+00> : vector<16xf32>
    %197 = vector.multi_reduction <add>, %196, %cst_130 [1] : vector<16x32xf32> to vector<16xf32>
    %198 = vector.shape_cast %197 : vector<16xf32> to vector<16x1xf32>
    %cst_131 = arith.constant 3.125000e-02 : f32
    %199 = vector.broadcast %cst_131 : f32 to vector<16x1xf32>
    %200 = arith.mulf %198, %199 : vector<16x1xf32>
    %201 = arith.mulf %196, %196 : vector<16x32xf32>
    %cst_132 = arith.constant dense<0.000000e+00> : vector<16xf32>
    %202 = vector.multi_reduction <add>, %201, %cst_132 [1] : vector<16x32xf32> to vector<16xf32>
    %203 = vector.shape_cast %202 : vector<16xf32> to vector<16x1xf32>
    %cst_133 = arith.constant 3.125000e-02 : f32
    %204 = vector.broadcast %cst_133 : f32 to vector<16x1xf32>
    %205 = arith.mulf %203, %204 : vector<16x1xf32>
    %206 = arith.mulf %200, %200 : vector<16x1xf32>
    %207 = arith.subf %205, %206 : vector<16x1xf32>
    %208 = vector.broadcast %200 : vector<16x1xf32> to vector<16x32xf32>
    %209 = arith.subf %196, %208 : vector<16x32xf32>
    %cst_134 = arith.constant 9.99999974E-6 : f32
    %210 = vector.broadcast %cst_134 : f32 to vector<16x1xf32>
    %211 = arith.addf %207, %210 : vector<16x1xf32>
    %212 = math.rsqrt %211 : vector<16x1xf32>
    %213 = vector.broadcast %212 : vector<16x1xf32> to vector<16x32xf32>
    %214 = arith.mulf %209, %213 : vector<16x32xf32>
    %c0_135 = arith.constant 0 : index
    %c0_136 = arith.constant 0 : index
    %215 = vector.load %arg13[%c0_135, %c0_136] : memref<1x32xf32, #tpu.memory_space<vmem>>, vector<1x32xf32>
    %216 = vector.broadcast %215 : vector<1x32xf32> to vector<16x32xf32>
    %217 = arith.mulf %214, %216 : vector<16x32xf32>
    %c0_137 = arith.constant 0 : index
    %c0_138 = arith.constant 0 : index
    %218 = vector.load %arg14[%c0_137, %c0_138] : memref<1x32xf32, #tpu.memory_space<vmem>>, vector<1x32xf32>
    %219 = vector.broadcast %218 : vector<1x32xf32> to vector<16x32xf32>
    %220 = arith.addf %217, %219 : vector<16x32xf32>
    %c0_139 = arith.constant 0 : index
    %c0_140 = arith.constant 0 : index
    %221 = vector.load %arg15[%c0_139, %c0_140] : memref<32x128xf32, #tpu.memory_space<vmem>>, vector<32x128xf32>
    %cst_141 = arith.constant dense<0.000000e+00> : vector<16x128xf32>
    %222 = tpu.matmul %220, %221, %cst_141 {dimension_numbers = #tpu.dot_dimension_numbers<[1], [0], [0], [1], [0, 0, 1, 1], [], []>} : vector<16x32xf32>, vector<32x128xf32>, vector<16x128xf32> -> vector<16x128xf32>
    %c0_142 = arith.constant 0 : index
    %c0_143 = arith.constant 0 : index
    %223 = vector.load %arg16[%c0_142, %c0_143] : memref<1x128xf32, #tpu.memory_space<vmem>>, vector<1x128xf32>
    %224 = vector.broadcast %223 : vector<1x128xf32> to vector<16x128xf32>
    %225 = arith.addf %222, %224 : vector<16x128xf32>
    %cst_144 = arith.constant 1.702000e+00 : f32
    %226 = vector.broadcast %cst_144 : f32 to vector<16x128xf32>
    %227 = arith.mulf %226, %225 : vector<16x128xf32>
    %228 = arith.negf %227 : vector<16x128xf32>
    %229 = math.exp %228 : vector<16x128xf32>
    %cst_145 = arith.constant 1.000000e+00 : f32
    %230 = vector.broadcast %cst_145 : f32 to vector<16x128xf32>
    %231 = arith.addf %230, %229 : vector<16x128xf32>
    %232 = arith.divf %230, %231 : vector<16x128xf32>
    %233 = arith.mulf %225, %232 : vector<16x128xf32>
    %c0_146 = arith.constant 0 : index
    %c0_147 = arith.constant 0 : index
    %234 = vector.load %arg17[%c0_146, %c0_147] : memref<128x32xf32, #tpu.memory_space<vmem>>, vector<128x32xf32>
    %cst_148 = arith.constant dense<0.000000e+00> : vector<16x32xf32>
    %235 = tpu.matmul %233, %234, %cst_148 {dimension_numbers = #tpu.dot_dimension_numbers<[1], [0], [0], [1], [0, 0, 1, 1], [], []>} : vector<16x128xf32>, vector<128x32xf32>, vector<16x32xf32> -> vector<16x32xf32>
    %c0_149 = arith.constant 0 : index
    %c0_150 = arith.constant 0 : index
    %236 = vector.load %arg18[%c0_149, %c0_150] : memref<1x32xf32, #tpu.memory_space<vmem>>, vector<1x32xf32>
    %237 = vector.broadcast %236 : vector<1x32xf32> to vector<16x32xf32>
    %238 = arith.addf %235, %237 : vector<16x32xf32>
    %239 = arith.addf %196, %238 : vector<16x32xf32>
    %c0_151 = arith.constant 0 : index
    %c0_152 = arith.constant 0 : index
    %240 = vector.load %arg19[%c0_151, %c0_152] : memref<16x32xf32, #tpu.memory_space<vmem>>, vector<16x32xf32>
    tpu.vector_store %arg19[%c0_151, %c0_152], %239 {strides = array<i32>} : memref<16x32xf32, #tpu.memory_space<vmem>>, vector<16x32xf32>,
    return
  }
  func.func @transform_0(%arg0: i32) -> (i32, i32) {
    %c0_i32 = arith.constant 0 : i32
    %c0_i32_0 = arith.constant 0 : i32
    return %arg0, %c0_i32 : i32, i32
  }
  func.func @transform_1(%arg0: i32) -> (i32, i32) {
    %c0_i32 = arith.constant 0 : i32
    %c0_i32_0 = arith.constant 0 : i32
    %c0_i32_1 = arith.constant 0 : i32
    return %c0_i32, %c0_i32_0 : i32, i32
  }
  func.func @transform_2(%arg0: i32) -> (i32, i32) {
    %c0_i32 = arith.constant 0 : i32
    %c0_i32_0 = arith.constant 0 : i32
    %c0_i32_1 = arith.constant 0 : i32
    return %c0_i32, %c0_i32_0 : i32, i32
  }
  func.func @transform_3(%arg0: i32) -> (i32, i32) {
    %c0_i32 = arith.constant 0 : i32
    %c0_i32_0 = arith.constant 0 : i32
    %c0_i32_1 = arith.constant 0 : i32
    return %c0_i32, %c0_i32_0 : i32, i32
  }
  func.func @transform_4(%arg0: i32) -> (i32, i32, i32) {
    %c0_i32 = arith.constant 0 : i32
    %c0_i32_0 = arith.constant 0 : i32
    %c0_i32_1 = arith.constant 0 : i32
    %c0_i32_2 = arith.constant 0 : i32
    return %c0_i32, %c0_i32_0, %c0_i32_1 : i32, i32, i32
  }
  func.func @transform_5(%arg0: i32) -> (i32, i32, i32) {
    %c0_i32 = arith.constant 0 : i32
    %c0_i32_0 = arith.constant 0 : i32
    %c0_i32_1 = arith.constant 0 : i32
    %c0_i32_2 = arith.constant 0 : i32
    return %c0_i32, %c0_i32_0, %c0_i32_1 : i32, i32, i32
  }
  func.func @transform_6(%arg0: i32) -> (i32, i32, i32) {
    %c0_i32 = arith.constant 0 : i32
    %c0_i32_0 = arith.constant 0 : i32
    %c0_i32_1 = arith.constant 0 : i32
    %c0_i32_2 = arith.constant 0 : i32
    return %c0_i32, %c0_i32_0, %c0_i32_1 : i32, i32, i32
  }
  func.func @transform_7(%arg0: i32) -> (i32, i32, i32) {
    %c0_i32 = arith.constant 0 : i32
    %c0_i32_0 = arith.constant 0 : i32
    %c0_i32_1 = arith.constant 0 : i32
    %c0_i32_2 = arith.constant 0 : i32
    return %c0_i32, %c0_i32_0, %c0_i32_1 : i32, i32, i32
  }
  func.func @transform_8(%arg0: i32) -> (i32, i32, i32) {
    %c0_i32 = arith.constant 0 : i32
    %c0_i32_0 = arith.constant 0 : i32
    %c0_i32_1 = arith.constant 0 : i32
    %c0_i32_2 = arith.constant 0 : i32
    return %c0_i32, %c0_i32_0, %c0_i32_1 : i32, i32, i32
  }
  func.func @transform_9(%arg0: i32) -> (i32, i32, i32) {
    %c0_i32 = arith.constant 0 : i32
    %c0_i32_0 = arith.constant 0 : i32
    %c0_i32_1 = arith.constant 0 : i32
    %c0_i32_2 = arith.constant 0 : i32
    return %c0_i32, %c0_i32_0, %c0_i32_1 : i32, i32, i32
  }
  func.func @transform_10(%arg0: i32) -> (i32, i32, i32) {
    %c0_i32 = arith.constant 0 : i32
    %c0_i32_0 = arith.constant 0 : i32
    %c0_i32_1 = arith.constant 0 : i32
    %c0_i32_2 = arith.constant 0 : i32
    return %c0_i32, %c0_i32_0, %c0_i32_1 : i32, i32, i32
  }
  func.func @transform_11(%arg0: i32) -> (i32, i32) {
    %c0_i32 = arith.constant 0 : i32
    %c0_i32_0 = arith.constant 0 : i32
    %c0_i32_1 = arith.constant 0 : i32
    return %c0_i32, %c0_i32_0 : i32, i32
  }
  func.func @transform_12(%arg0: i32) -> (i32, i32) {
    %c0_i32 = arith.constant 0 : i32
    %c0_i32_0 = arith.constant 0 : i32
    %c0_i32_1 = arith.constant 0 : i32
    return %c0_i32, %c0_i32_0 : i32, i32
  }
  func.func @transform_13(%arg0: i32) -> (i32, i32) {
    %c0_i32 = arith.constant 0 : i32
    %c0_i32_0 = arith.constant 0 : i32
    %c0_i32_1 = arith.constant 0 : i32
    return %c0_i32, %c0_i32_0 : i32, i32
  }
  func.func @transform_14(%arg0: i32) -> (i32, i32) {
    %c0_i32 = arith.constant 0 : i32
    %c0_i32_0 = arith.constant 0 : i32
    %c0_i32_1 = arith.constant 0 : i32
    return %c0_i32, %c0_i32_0 : i32, i32
  }
  func.func @transform_15(%arg0: i32) -> (i32, i32) {
    %c0_i32 = arith.constant 0 : i32
    %c0_i32_0 = arith.constant 0 : i32
    %c0_i32_1 = arith.constant 0 : i32
    return %c0_i32, %c0_i32_0 : i32, i32
  }
  func.func @transform_16(%arg0: i32) -> (i32, i32) {
    %c0_i32 = arith.constant 0 : i32
    %c0_i32_0 = arith.constant 0 : i32
    %c0_i32_1 = arith.constant 0 : i32
    return %c0_i32, %c0_i32_0 : i32, i32
  }
  func.func @transform_17(%arg0: i32) -> (i32, i32) {
    %c0_i32 = arith.constant 0 : i32
    %c0_i32_0 = arith.constant 0 : i32
    %c0_i32_1 = arith.constant 0 : i32
    return %c0_i32, %c0_i32_0 : i32, i32
  }
  func.func @transform_18(%arg0: i32) -> (i32, i32) {
    %c0_i32 = arith.constant 0 : i32
    %c0_i32_0 = arith.constant 0 : i32
    return %arg0, %c0_i32 : i32, i32
  }
}

</mosaic_0001>

<bundles_post_ra>
// kernel: tpu_custom_call.1
= control target key start
LH: loop header
LB: loop body
LE: loop exit
PB: predicated region body
PF: predicated region fallthrough
CT: control target
= control target key end

     0   :  { %s3924_s0 = inlined_call_operand.vmem [shape: f32[16,32], index: 0, kind: input, shape index: {}]   ;;  %s3925_s1 = inlined_call_operand.vmem [shape: f32[16,16], index: 1, kind: input, shape index: {}]   ;;  %s3926_s2 = inlined_call_operand.vmem [shape: f32[1,32], index: 2, kind: input, shape index: {}]   ;;  %s3927_s3 = inlined_call_operand.vmem [shape: f32[1,32], index: 3, kind: input, shape index: {}]   ;;  %s3928_s4 = inlined_call_operand.vmem [shape: f32[4,32,8], index: 4, kind: input, shape index: {}]   ;;  %s3929_s5 = inlined_call_operand.vmem [shape: f32[4,1,8], index: 5, kind: input, shape index: {}]   ;;  %s3930_s6 = inlined_call_operand.vmem [shape: f32[4,32,8], index: 6, kind: input, shape index: {}]   ;;  %s3931_s7 = inlined_call_operand.vmem [shape: f32[4,1,8], index: 7, kind: input, shape index: {}]   ;;  %s3932_s8 = inlined_call_operand.vmem [shape: f32[4,32,8], index: 8, kind: input, shape index: {}]   ;;  %s3933_s9 = inlined_call_operand.vmem [shape: f32[4,1,8], index: 9, kind: input, shape index: {}]   ;;  %s3934_s10 = inlined_call_operand.vmem [shape: f32[4,8,32], index: 10, kind: input, shape index: {}]   ;;  %s3935_s11 = inlined_call_operand.vmem [shape: f32[1,32], index: 11, kind: input, shape index: {}]   ;;  %s3936_s12 = inlined_call_operand.vmem [shape: f32[1,32], index: 12, kind: input, shape index: {}]   ;;  %s3937_s13 = inlined_call_operand.vmem [shape: f32[1,32], index: 13, kind: input, shape index: {}]   ;;  %s3938_s14 = inlined_call_operand.vmem [shape: f32[32,128], index: 14, kind: input, shape index: {}]   ;;  %s3939_s15 = inlined_call_operand.vmem [shape: f32[1,128], index: 15, kind: input, shape index: {}]   ;;  %s3940_s16 = inlined_call_operand.vmem [shape: f32[128,32], index: 16, kind: input, shape index: {}]   ;;  %s3941_s17 = inlined_call_operand.vmem [shape: f32[1,32], index: 17, kind: input, shape index: {}]   ;;  %s3942_s18 = inlined_call_operand.hbm [shape: f32[16,32], index: 18, kind: output, shape index: {}]  }
   0x1   :  { %3945 = sst [smem:[#allocation5_spill]] %s3924_s0 }
   0x2   :  { %3946 = sst [smem:[#allocation6_spill]] %s3925_s1 }
   0x3   :  { %3947 = sst [smem:[#allocation7_spill]] %s3926_s2 }
   0x4   :  { %s3948_s29 = sld [smem:[#allocation5_spill]]  ;;  %vm62_vm0 = vcmask 261120  }
   0xa   :  { %v3458_v0 = vld [vmem:[%s3948_s29] sm:$0xff]  ;;  %v3463_v1 = vld [vmem:[%s3948_s29 + $0x8] sm:$0xff] }
   0xb   :  { %23 = vsyncpa [#allocation3], 0  ;;  %v63_v2 = vsel %vm62_vm0, %v3458_v0, 0.0  ;;  %v71_v3 = vmul.f32 %v3458_v0, %v3458_v0  ;;  %v72_v4 = vmul.f32 %v3463_v1, %v3463_v1  ;;  %v66_v6 = vsel %vm62_vm0, %v3463_v1, 0.0  ;;  %v122_v8 = vld [vmem:[%s3928_s4] sm:$0xff]  ;;  %v123_v9 = vld [vmem:[%s3928_s4 + $0x8] sm:$0xff] }
   0xc   :  { %64 = vadd.xlane.f32.xlu0 %v63_v2  ;;  %v3098_v10 = vpack.c.bf16 %v123_v9, %v122_v8  ;;  %v124_v11 = vld [vmem:[%s3928_s4 + $0x10] sm:$0xff]  ;;  %v125_v12 = vld [vmem:[%s3928_s4 + $0x18] sm:$0xff]  ;;  %v214_v14 = vld [vmem:[%s3930_s6] sm:$0xff]  ;;  %s3949_s0 = sld [smem:[#allocation7_spill]]  ;;  %vm386_vm1 = vcmask 64512   ;;  %s3952_s30 = sld [smem:[#allocation6_spill]] }
   0xd   :  { %v73_v5 = vsel %vm62_vm0, %v71_v3, 0.0  ;;  %v76_v7 = vsel %vm62_vm0, %v72_v4, 0.0  ;;  %v3102_v13 = vpack.c.bf16 %v125_v12, %v124_v11  ;;  %v215_v15 = vld [vmem:[%s3930_s6 + $0x8] sm:$0xff]  ;;  %v2578_v35 = vld [vmem:[%s3927_s3] ss:$0 sm:$0xff]  ;;  %v216_v41 = vld [vmem:[%s3930_s6 + $0x10] sm:$0xff] }
   0xe   :  { %74 = vadd.xlane.f32.xlu1 %v73_v5  ;;  %3099 = vmatprep.subr.bf16.mxu0 %v3098_v10  ;;  %v3106_v16 = vpack.c.bf16 %v215_v15, %v214_v14  ;;  %v217_v42 = vld [vmem:[%s3930_s6 + $0x18] sm:$0xff]  ;;  %v300_v46 = vld [vmem:[%s3932_s8] sm:$0xff]  ;;  %v301_v47 = vld [vmem:[%s3932_s8 + $0x8] sm:$0xff]  ;;  %vm474_vm3 = vcmask 130048  }
   0xf   :  { %3101 = vmatpush3.bf16.msra.mxu0 %v3098_v10  ;;  %v3110_v45 = vpack.c.bf16 %v217_v42, %v216_v41  ;;  %v3114_v48 = vpack.c.bf16 %v301_v47, %v300_v46  ;;  %v302_v49 = vld [vmem:[%s3932_s8 + $0x10] sm:$0xff]  ;;  %v303_v50 = vld [vmem:[%s3932_s8 + $0x18] sm:$0xff]  ;;  %v2580_v52 = vld [vmem:[%s3929_s5] ss:$0 sm:$0xff] }
  0x10   :  { %67 = vadd.xlane.f32.xlu0 %v66_v6  ;;  %3103 = vmatprep.subr.bf16.mxu0 %v3102_v13  ;;  %v3118_v51 = vpack.c.bf16 %v303_v50, %v302_v49  ;;  %v2583_v56 = vld [vmem:[%s3931_s7] ss:$0 sm:$0xff]  ;;  %v2606_v61 = vld [vmem:[%s3930_s6 + $0x28] sm:$0xff]  ;;  %vm3550_vm2 = vmpackc.low %vm386_vm1, %vm386_vm1 }
  0x11   :  { %v2605_v60 = vld [vmem:[%s3930_s6 + $0x20] sm:$0xff]  ;;  %v2607_v8 = vld [vmem:[%s3930_s6 + $0x30] sm:$0xff]  ;;  %v2608_v9 = vld [vmem:[%s3930_s6 + $0x38] sm:$0xff] }
  0x12   :  { %77 = vadd.xlane.f32.xlu1 %v76_v7  ;;  %v2577_v33 = vld [vmem:[%s3949_s0] ss:$0 sm:$0xff]  ;;  %v3140_v3 = vpack.c.bf16 %v2606_v61, %v2605_v60  ;;  %v3575_v14 = vld [vmem:[%s3952_s30 + $0x8] sm:$0xff] }
  0x13   :  { %3105 = vmatpush3.bf16.msra.mxu0 %v3102_v13  ;;  %v2586_v4 = vld [vmem:[%s3933_s9] ss:$0 sm:$0xff]  ;;  %v3144_v13 = vpack.c.bf16 %v2608_v9, %v2607_v8  ;;  %v2602_v8 = vld [vmem:[%s3929_s5 + $0x1] ss:$0 sm:$0xff] }
  0x14   :  { %3107 = vmatprep.subr.bf16.mxu0 %v3106_v16  ;;  %v3580_v15 = vld [vmem:[%s3952_s30] sm:$0xff] }
  0x15   :  { %v2613_v61 = vld [vmem:[%s3932_s8 + $0x20] sm:$0xff] }
  0x99   :  { %v65_v17 = vpop.xlane.xlu0 %64 }
  0x9a   :  { %v69_v18 = vmul.f32 0.03125, %v65_v17 }
  0x9b   :  { %v75_v19 = vpop.xlane.xlu1 %74 }
  0x9c   :  { %v81_v20 = vmul.f32 %v69_v18, %v69_v18  ;;  %v79_v21 = vmul.f32 0.03125, %v75_v19  ;;  %v85_v31 = vsub.f32 %v3458_v0, %v69_v18 }
  0x9d   :  { %v68_v22 = vpop.xlane.xlu0 %67 }
  0x9e   :  { %v83_v23 = vsub.f32 %v79_v21, %v81_v20  ;;  %v70_v24 = vmul.f32 0.03125, %v68_v22  ;;  %v2610_v22 = vld [vmem:[%s3931_s7 + $0x1] ss:$0 sm:$0xff] }
  0x9f   :  { %v78_v25 = vpop.xlane.xlu1 %77 }
  0xa0   :  { %v87_v26 = vadd.f32 1e-05, %v83_v23  ;;  %v82_v27 = vmul.f32 %v70_v24, %v70_v24  ;;  %v80_v28 = vmul.f32 0.03125, %v78_v25  ;;  %v86_v37 = vsub.f32 %v3463_v1, %v70_v24 }
  0xa2   :  { %3285 = vrsqrt.f32 %v87_v26  ;;  %v84_v29 = vsub.f32 %v80_v28, %v82_v27 }
  0xa4   :  { %v88_v30 = vadd.f32 1e-05, %v84_v29 }
  0xa6   :  { %3287 = vrsqrt.f32 %v88_v30 }
  0xac   :  { %v3286_v32 = vpop.eup %3285 }
  0xad   :  { %v91_v34 = vmul.f32 %v3286_v32, %v85_v31 }
  0xaf   :  { %v100_v36 = vmul.f32 %v2577_v33, %v91_v34 }
  0xb0   :  { %v3288_v38 = vpop.eup %3287 }
  0xb1   :  { %v3501_v39 = vadd.f32 %v2578_v35, %v100_v36  ;;  %v92_v40 = vmul.f32 %v3288_v38, %v86_v37  ;;  %v584_v38 = vld [vmem:[%s3934_s10] sm:$0xff] }
  0xb3   :  { %v101_v43 = vmul.f32 %v2577_v33, %v92_v40  ;;  %2852 = vmatprep.mubr.msk.f32.mxu0 %vm62_vm0, %v3501_v39 }
  0xb5   :  { %v3511_v44 = vadd.f32 %v2578_v35, %v101_v43 }
  0xb7   :  { %2853 = vmatmul.mubr.msk.f32.vlgmr.msra.gmra.mrb[0].mxu0 %vm62_vm0, %v3511_v44 }
  0xb8   :  { %3109 = vmatpush3.bf16.msra.mxu0 %v3106_v16  ;;  %2863 = vmatprep.mubr.msk.f32.mxu0 %vm62_vm0, %v3501_v39 }
  0xb9   :  { %3111 = vmatprep.subr.bf16.mxu0 %v3110_v45 }
  0xbc   :  { %3113 = vmatpush3.bf16.msra.mxu0 %v3110_v45 }
  0xbd   :  { %3115 = vmatprep.subr.bf16.mxu0 %v3114_v48 }
  0xbf   :  { %2864 = vmatmul.mubr.msk.f32.vlgmr.msra.gmra.mrb[2].mxu0 %vm62_vm0, %v3511_v44 }
  0xc0   :  { %3117 = vmatpush3.bf16.msra.mxu0 %v3114_v48  ;;  %2874 = vmatprep.mubr.msk.f32.mxu0 %vm62_vm0, %v3501_v39 }
  0xc1   :  { %3119 = vmatprep.subr.bf16.mxu0 %v3118_v51 }
  0xc4   :  { %3121 = vmatpush3.bf16.msra.mxu0 %v3118_v51 }
  0xc7   :  { %2875 = vmatmul.mubr.msk.f32.vlgmr.msra.gmra.mrb[4].mxu0 %vm62_vm0, %v3511_v44 }
 0x18a   :  { %v2854_v53 = vpop.f32.mrb[0].mxu0 }
 0x18b   :  { %v205_v54 = vpop.f32.mrb[1].mxu0  ;;  %v211_v11 = vadd.f32 %v2854_v53, %v2580_v52  ;;  %v2597_v53 = vld [vmem:[%s3928_s4 + $0x20] sm:$0xff] }
 0x18c   :  { %v206_v55 = vadd.f32 %v2580_v52, %v205_v54  ;;  %v2598_v54 = vld [vmem:[%s3928_s4 + $0x28] sm:$0xff] }
 0x18e   :  { %2881 = vmatprep.mubr.msk.f32.mxu1 %vm386_vm1, %v206_v55  ;;  %v3132_v55 = vpack.c.bf16 %v2598_v54, %v2597_v53  ;;  %v2632_v53 = vld [vmem:[%s3928_s4 + $0x50] sm:$0xff]  ;;  %v2633_v54 = vld [vmem:[%s3928_s4 + $0x58] sm:$0xff] }
 0x192   :  { %v2865_v57 = vpop.f32.mrb[2].mxu0 }
 0x193   :  { %v297_v58 = vadd.f32 %v2865_v57, %v2583_v56  ;;  %v291_v59 = vpop.f32.mrb[3].mxu0  ;;  %v2600_v57 = vld [vmem:[%s3928_s4 + $0x38] sm:$0xff] }
 0x194   :  { %v292_v62 = vadd.f32 %v2583_v56, %v291_v59  ;;  %v2599_v56 = vld [vmem:[%s3928_s4 + $0x30] sm:$0xff] }
 0x195   :  { %v3136_v60 = vpack.c.bf16 %v2600_v57, %v2599_v56  ;;  %v3170_v57 = vpack.c.bf16 %v2633_v54, %v2632_v53  ;;  %v2660_v53 = vld [vmem:[%s3934_s10 + $0x10] sm:$0xff] }
 0x196   :  { %v3122_v2 = vpack.c.bf16 %v297_v58, %v292_v62  ;;  %v2614_v62 = vld [vmem:[%s3932_s8 + $0x28] sm:$0xff] }
 0x198   :  { %3124 = vmatprep.subr.msk.bf16.mxu1 %vm3550_vm2, %v3122_v2 }
 0x199   :  { %3127 = vmatpush3.bf16.xpose.msk.msra.mxu1 %vm3550_vm2, %v3122_v2  ;;  %v3148_v2 = vpack.c.bf16 %v2614_v62, %v2613_v61  ;;  %v2648_v61 = vld [vmem:[%s3932_s8 + $0x50] sm:$0xff]  ;;  %v2649_v62 = vld [vmem:[%s3932_s8 + $0x58] sm:$0xff] }
 0x19a   :  { %v2876_v5 = vpop.f32.mrb[4].mxu0  ;;  %3141 = vmatprep.subr.bf16.mxu1 %v3140_v3 }
 0x19b   :  { %v383_v6 = vadd.f32 %v2876_v5, %v2586_v4  ;;  %v377_v7 = vpop.f32.mrb[5].mxu0 }
 0x19c   :  { %v378_v10 = vadd.f32 %v2586_v4, %v377_v7  ;;  %v2616_v4 = vld [vmem:[%s3932_s8 + $0x38] sm:$0xff] }
 0x19e   :  { %v3128_v12 = vpack.c.bf16 %v383_v6, %v378_v10 }
 0x1a0   :  { %2882 = vmatmul.mubr.msk.f32.vlgmr.msra.gmra.mrb[0].mxu1 %vm386_vm1, %v211_v11  ;;  %3129 = vmatprep.subr.bf16.mxu0 %v3128_v12 }
 0x1a1   :  { %3131 = vmatpush3.bf16.msra.mxu0 %v3128_v12  ;;  %3143 = vmatpush3.bf16.msra.mxu1 %v3140_v3  ;;  %v2615_v3 = vld [vmem:[%s3932_s8 + $0x30] sm:$0xff] }
 0x1a2   :  { %2915 = vmatprep.mubr.msk.f32.mxu1 %vm62_vm0, %v3501_v39  ;;  %3145 = vmatprep.subr.bf16.mxu1 %v3144_v13  ;;  %v3152_v5 = vpack.c.bf16 %v2616_v4, %v2615_v3  ;;  %v2638_v3 = vld [vmem:[%s3930_s6 + $0x40] sm:$0xff]  ;;  %v2639_v4 = vld [vmem:[%s3930_s6 + $0x48] sm:$0xff] }
 0x1a3   :  { %2891 = vmatprep.subr.mxu0 %v584_v38 }
 0x1a5   :  { %3147 = vmatpush3.bf16.msra.mxu1 %v3144_v13  ;;  %v2618_v13 = vld [vmem:[%s3933_s9 + $0x1] ss:$0 sm:$0xff] }
 0x1a8   :  { %2916 = vmatmul.mubr.msk.f32.vlgmr.msra.gmra.mrb[2].mxu1 %vm62_vm0, %v3511_v44 }
 0x273   :  { %v2883_v16 = vpop.f32.mrb[0].mxu1 }
 0x274   :  { %v471_v17 = vadd.f32 %v2883_v16, %v3575_v14  ;;  %v465_v18 = vpop.f32.mrb[1].mxu1 }
 0x275   :  { %v466_v19 = vadd.f32 %v465_v18, %v3580_v15 }
 0x276   :  { %v478_v20 = vsel %vm474_vm3, %v471_v17, -inf }
 0x277   :  { %479 = vmax.xlane.f32.xlu1 %v478_v20  ;;  %v475_v21 = vsel %vm474_vm3, %v466_v19, -inf }
 0x278   :  { %476 = vmax.xlane.f32.xlu0 %v475_v21 }
 0x27b   :  { %v2917_v23 = vpop.f32.mrb[2].mxu1 }
 0x27c   :  { %v841_v24 = vadd.f32 %v2917_v23, %v2610_v22  ;;  %v835_v25 = vpop.f32.mrb[3].mxu1 }
 0x27d   :  { %v836_v26 = vadd.f32 %v2610_v22, %v835_v25 }
 0x27f   :  { %v3156_v27 = vpack.c.bf16 %v841_v24, %v836_v26 }
 0x281   :  { %3158 = vmatprep.subr.msk.bf16.mxu1 %vm3550_vm2, %v3156_v27 }
 0x282   :  { %3161 = vmatpush3.bf16.xpose.msk.msra.mxu1 %vm3550_vm2, %v3156_v27 }
 0x304   :  { %v480_v28 = vpop.xlane.xlu1 %479 }
 0x305   :  { %v482_v29 = vsub.f32 %v471_v17, %v480_v28  ;;  %v477_v30 = vpop.xlane.xlu0 %476 }
 0x306   :  { %v481_v31 = vsub.f32 %v466_v19, %v477_v30 }
 0x307   :  { %v485_v32 = vmul.f32 1.442695, %v482_v29 }
 0x308   :  { %v483_v33 = vmul.f32 1.442695, %v481_v31 }
 0x309   :  { %3289 = vpow2.f32 %v485_v32 }
 0x30a   :  { %3291 = vpow2.f32 %v483_v33 }
 0x313   :  { %v3290_v34 = vpop.eup %3289 }
 0x314   :  { %v3292_v35 = vpop.eup %3291  ;;  %v490_v36 = vsel %vm474_vm3, %v3290_v34, 0.0 }
 0x315   :  { %491 = vadd.xlane.f32.xlu1 %v490_v36  ;;  %v487_v37 = vsel %vm474_vm3, %v3292_v35, 0.0 }
 0x316   :  { %488 = vadd.xlane.f32.xlu0 %v487_v37  ;;  %v2630_v37 = vld [vmem:[%s3928_s4 + $0x40] sm:$0xff] }
 0x3a2   :  { %v492_v40 = vpop.xlane.xlu1 %491 }
 0x3a3   :  { %3293 = vrcp.f32 %v492_v40  ;;  %v489_v41 = vpop.xlane.xlu0 %488 }
 0x3a4   :  { %3295 = vrcp.f32 %v489_v41 }
 0x3ad   :  { %v3294_v42 = vpop.eup %3293 }
 0x3ae   :  { %v3296_v43 = vpop.eup %3295  ;;  %v496_v45 = vmul.f32 %v3294_v42, %v492_v40 }
 0x3af   :  { %v495_v46 = vmul.f32 %v3296_v43, %v489_v41  ;;  %v2627_v41 = vld [vmem:[%s3934_s10 + $0x8] sm:$0xff] }
 0x3b0   :  { %v498_v47 = vsub.f32 2.0, %v496_v45  ;;  %2943 = vmatprep.subr.mxu1 %v2627_v41 }
 0x3b1   :  { %v497_v48 = vsub.f32 2.0, %v495_v46 }
 0x3b2   :  { %v500_v49 = vmul.f32 %v3294_v42, %v498_v47 }
 0x3b3   :  { %v499_v50 = vmul.f32 %v3296_v43, %v497_v48 }
 0x3b4   :  { %v502_v52 = vmul.f32 %v3290_v34, %v500_v49 }
 0x3b5   :  { %v501_v51 = vmul.f32 %v3292_v35, %v499_v50 }
 0x3b7   :  { %2888 = vmatprep.mubr.msk.f32.mxu0 %vm474_vm3, %v501_v51 }
 0x3b8   :  { %2889 = vmatmul.mubr.msk.f32.vlgmr.msra.gmra.mrb[6].mxu0 %vm474_vm3, %v502_v52 }
 0x3b9   :  { %2892 = vmatpush3.msra.mxu0 %v584_v38  ;;  %v2631_v38 = vld [vmem:[%s3928_s4 + $0x48] sm:$0xff] }
 0x3ba   :  { %3133 = vmatprep.subr.bf16.mxu0 %v3132_v55  ;;  %v3166_v40 = vpack.c.bf16 %v2631_v38, %v2630_v37 }
 0x48b   :  { %v2890_v58 = vpop.f32.mrb[6].mxu0 }
 0x48c   :  { %v575_v59 = vpop.f32.mrb[7].mxu0 }
 0x48d   :  { %2893 = vmatprep.mubr.msk.f32.mxu0 %vm386_vm1, %v575_v59  ;;  %v2647_v59 = vld [vmem:[%s3932_s8 + $0x48] sm:$0xff] }
 0x48e   :  { %2894 = vmatmul.mubr.msk.f32.vlgmr.msra.gmra.mrb[8].mxu0 %vm386_vm1, %v2890_v58  ;;  %v2646_v58 = vld [vmem:[%s3932_s8 + $0x40] sm:$0xff] }
 0x48f   :  { %3135 = vmatpush3.bf16.msra.mxu0 %v3132_v55  ;;  %2904 = vmatprep.mubr.msk.f32.mxu0 %vm62_vm0, %v3501_v39 }
 0x490   :  { %3137 = vmatprep.subr.bf16.mxu0 %v3136_v60 }
 0x493   :  { %3139 = vmatpush3.bf16.msra.mxu0 %v3136_v60  ;;  %v3182_v60 = vpack.c.bf16 %v2647_v59, %v2646_v58 }
 0x494   :  { %3149 = vmatprep.subr.bf16.mxu0 %v3148_v2 }
 0x496   :  { %2905 = vmatmul.mubr.msk.f32.vlgmr.msra.gmra.mrb[10].mxu0 %vm62_vm0, %v3511_v44 }
 0x497   :  { %3151 = vmatpush3.bf16.msra.mxu0 %v3148_v2  ;;  %2926 = vmatprep.mubr.msk.f32.mxu0 %vm62_vm0, %v3501_v39  ;;  %v3186_v2 = vpack.c.bf16 %v2649_v62, %v2648_v61 }
 0x498   :  { %3153 = vmatprep.subr.bf16.mxu0 %v3152_v5 }
 0x49b   :  { %3155 = vmatpush3.bf16.msra.mxu0 %v3152_v5  ;;  %v3174_v5 = vpack.c.bf16 %v2639_v4, %v2638_v3  ;;  %v2665_v3 = vld [vmem:[%s3928_s4 + $0x70] sm:$0xff]  ;;  %v2666_v4 = vld [vmem:[%s3928_s4 + $0x78] sm:$0xff] }
 0x49e   :  { %2927 = vmatmul.mubr.msk.f32.vlgmr.msra.gmra.mrb[12].mxu0 %vm62_vm0, %v3511_v44 }
 0x561   :  { %v3634_v6 = vpop.f32.mrb[8].mxu0 }
 0x562   :  { %v3636_v7 = vpop.f32.mrb[9].mxu0 }
 0x569   :  { %v2906_v9 = vpop.f32.mrb[10].mxu0 }
 0x56a   :  { %v747_v10 = vpop.f32.mrb[11].mxu0  ;;  %v753_v12 = vadd.f32 %v2906_v9, %v2602_v8  ;;  %v2641_v9 = vld [vmem:[%s3930_s6 + $0x58] sm:$0xff] }
 0x56b   :  { %v748_v11 = vadd.f32 %v2602_v8, %v747_v10  ;;  %v2640_v8 = vld [vmem:[%s3930_s6 + $0x50] sm:$0xff] }
 0x56d   :  { %2933 = vmatprep.mubr.msk.f32.mxu1 %vm386_vm1, %v748_v11 }
 0x56e   :  { %2934 = vmatmul.mubr.msk.f32.vlgmr.msra.gmra.mrb[4].mxu1 %vm386_vm1, %v753_v12  ;;  %v3178_v12 = vpack.c.bf16 %v2641_v9, %v2640_v8  ;;  %v3204_v9 = vpack.c.bf16 %v2666_v4, %v2665_v3 }
 0x56f   :  { %2944 = vmatpush3.msra.mxu1 %v2627_v41 }
 0x570   :  { %3175 = vmatprep.subr.bf16.mxu1 %v3174_v5 }
 0x571   :  { %v2928_v16 = vpop.f32.mrb[12].mxu0 }
 0x572   :  { %v929_v17 = vadd.f32 %v2928_v16, %v2618_v13  ;;  %v923_v18 = vpop.f32.mrb[13].mxu0 }
 0x573   :  { %v924_v19 = vadd.f32 %v2618_v13, %v923_v18  ;;  %v2635_v13 = vld [vmem:[%s3929_s5 + $0x2] ss:$0 sm:$0xff] }
 0x575   :  { %v3162_v20 = vpack.c.bf16 %v929_v17, %v924_v19 }
 0x577   :  { %3163 = vmatprep.subr.bf16.mxu0 %v3162_v20 }
 0x578   :  { %3165 = vmatpush3.bf16.msra.mxu0 %v3162_v20  ;;  %v2651_v20 = vld [vmem:[%s3933_s9 + $0x2] ss:$0 sm:$0xff] }
 0x579   :  { %3167 = vmatprep.subr.bf16.mxu0 %v3166_v40 }
 0x641   :  { %v2935_v21 = vpop.f32.mrb[4].mxu1 }
 0x642   :  { %v1016_v22 = vadd.f32 %v2935_v21, %v3575_v14  ;;  %v1010_v23 = vpop.f32.mrb[5].mxu1 }
 0x643   :  { %v1011_v24 = vadd.f32 %v1010_v23, %v3580_v15 }
 0x644   :  { %v1022_v25 = vsel %vm474_vm3, %v1016_v22, -inf }
 0x645   :  { %1023 = vmax.xlane.f32.xlu1 %v1022_v25  ;;  %v1019_v26 = vsel %vm474_vm3, %v1011_v24, -inf }
 0x646   :  { %1020 = vmax.xlane.f32.xlu0 %v1019_v26  ;;  %v2643_v26 = vld [vmem:[%s3931_s7 + $0x2] ss:$0 sm:$0xff] }
 0x6d2   :  { %v1024_v27 = vpop.xlane.xlu1 %1023 }
 0x6d3   :  { %v1026_v28 = vsub.f32 %v1016_v22, %v1024_v27  ;;  %v1021_v29 = vpop.xlane.xlu0 %1020 }
 0x6d4   :  { %v1025_v30 = vsub.f32 %v1011_v24, %v1021_v29 }
 0x6d5   :  { %v1029_v31 = vmul.f32 1.442695, %v1026_v28 }
 0x6d6   :  { %v1027_v32 = vmul.f32 1.442695, %v1025_v30 }
 0x6d7   :  { %3297 = vpow2.f32 %v1029_v31 }
 0x6d8   :  { %3299 = vpow2.f32 %v1027_v32 }
 0x6e1   :  { %v3298_v33 = vpop.eup %3297 }
 0x6e2   :  { %v3300_v34 = vpop.eup %3299  ;;  %v1034_v35 = vsel %vm474_vm3, %v3298_v33, 0.0 }
 0x6e3   :  { %1035 = vadd.xlane.f32.xlu1 %v1034_v35  ;;  %v1031_v36 = vsel %vm474_vm3, %v3300_v34, 0.0 }
 0x6e4   :  { %1032 = vadd.xlane.f32.xlu0 %v1031_v36 }
 0x770   :  { %v1036_v42 = vpop.xlane.xlu1 %1035 }
 0x771   :  { %3301 = vrcp.f32 %v1036_v42  ;;  %v1033_v43 = vpop.xlane.xlu0 %1032 }
 0x772   :  { %3303 = vrcp.f32 %v1033_v43 }
 0x77b   :  { %v3302_v45 = vpop.eup %3301 }
 0x77c   :  { %v3304_v46 = vpop.eup %3303  ;;  %v1040_v47 = vmul.f32 %v3302_v45, %v1036_v42 }
 0x77d   :  { %v1039_v48 = vmul.f32 %v3304_v46, %v1033_v43 }
 0x77e   :  { %v1042_v49 = vsub.f32 2.0, %v1040_v47 }
 0x77f   :  { %v1041_v50 = vsub.f32 2.0, %v1039_v48 }
 0x780   :  { %v1044_v51 = vmul.f32 %v3302_v45, %v1042_v49 }
 0x781   :  { %v1043_v52 = vmul.f32 %v3304_v46, %v1041_v50  ;;  %v2663_v50 = vld [vmem:[%s3928_s4 + $0x60] sm:$0xff] }
 0x782   :  { %v1046_v56 = vmul.f32 %v3298_v33, %v1044_v51  ;;  %v2664_v51 = vld [vmem:[%s3928_s4 + $0x68] sm:$0xff] }
 0x783   :  { %v1045_v55 = vmul.f32 %v3300_v34, %v1043_v52  ;;  %v3200_v52 = vpack.c.bf16 %v2664_v51, %v2663_v50 }
 0x785   :  { %2940 = vmatprep.mubr.msk.f32.mxu0 %vm474_vm3, %v1045_v55 }
 0x786   :  { %2941 = vmatmul.mubr.msk.f32.vlgmr.msra.gmra.mrb[14].mxu0 %vm474_vm3, %v1046_v56 }
 0x787   :  { %3169 = vmatpush3.bf16.msra.mxu0 %v3166_v40  ;;  %2956 = vmatprep.mubr.msk.f32.mxu0 %vm62_vm0, %v3501_v39 }
 0x788   :  { %3171 = vmatprep.subr.bf16.mxu0 %v3170_v57 }
 0x78b   :  { %3173 = vmatpush3.bf16.msra.mxu0 %v3170_v57 }
 0x78c   :  { %3183 = vmatprep.subr.bf16.mxu0 %v3182_v60 }
 0x78e   :  { %2957 = vmatmul.mubr.msk.f32.vlgmr.msra.gmra.mrb[16].mxu0 %vm62_vm0, %v3511_v44 }
 0x78f   :  { %3185 = vmatpush3.bf16.msra.mxu0 %v3182_v60  ;;  %2978 = vmatprep.mubr.msk.f32.mxu0 %vm62_vm0, %v3501_v39 }
 0x790   :  { %3187 = vmatprep.subr.bf16.mxu0 %v3186_v2 }
 0x793   :  { %3189 = vmatpush3.bf16.msra.mxu0 %v3186_v2 }
 0x796   :  { %2979 = vmatmul.mubr.msk.f32.vlgmr.msra.gmra.mrb[18].mxu0 %vm62_vm0, %v3511_v44 }
 0x859   :  { %v2942_v10 = vpop.f32.mrb[14].mxu0 }
 0x85a   :  { %v1119_v11 = vpop.f32.mrb[15].mxu0 }
 0x85b   :  { %2945 = vmatprep.mubr.msk.f32.mxu1 %vm386_vm1, %v1119_v11  ;;  %v2680_v11 = vld [vmem:[%s3932_s8 + $0x68] sm:$0xff] }
 0x85c   :  { %2946 = vmatmul.mubr.msk.f32.vlgmr.msra.gmra.mrb[6].mxu1 %vm386_vm1, %v2942_v10  ;;  %v2679_v10 = vld [vmem:[%s3932_s8 + $0x60] sm:$0xff] }
 0x85d   :  { %3177 = vmatpush3.bf16.msra.mxu1 %v3174_v5  ;;  %2967 = vmatprep.mubr.msk.f32.mxu1 %vm62_vm0, %v3501_v39 }
 0x85e   :  { %3179 = vmatprep.subr.bf16.mxu1 %v3178_v12 }
 0x861   :  { %v2958_v16 = vpop.f32.mrb[16].mxu0  ;;  %3181 = vmatpush3.bf16.msra.mxu1 %v3178_v12  ;;  %v3216_v12 = vpack.c.bf16 %v2680_v11, %v2679_v10 }
 0x862   :  { %v1298_v17 = vadd.f32 %v2958_v16, %v2635_v13  ;;  %v1292_v18 = vpop.f32.mrb[17].mxu0  ;;  %v2682_v16 = vld [vmem:[%s3932_s8 + $0x78] sm:$0xff] }
 0x863   :  { %v1293_v19 = vadd.f32 %v2635_v13, %v1292_v18  ;;  %v2681_v13 = vld [vmem:[%s3932_s8 + $0x70] sm:$0xff]  ;;  %v2671_v18 = vld [vmem:[%s3930_s6 + $0x60] sm:$0xff] }
 0x864   :  { %2968 = vmatmul.mubr.msk.f32.vlgmr.msra.gmra.mrb[8].mxu1 %vm62_vm0, %v3511_v44 }
 0x865   :  { %2985 = vmatprep.mubr.msk.f32.mxu1 %vm386_vm1, %v1293_v19  ;;  %v2672_v19 = vld [vmem:[%s3930_s6 + $0x68] sm:$0xff] }
 0x869   :  { %v2980_v21 = vpop.f32.mrb[18].mxu0 }
 0x86a   :  { %v1474_v22 = vadd.f32 %v2980_v21, %v2651_v20  ;;  %v1468_v23 = vpop.f32.mrb[19].mxu0  ;;  %v2673_v21 = vld [vmem:[%s3930_s6 + $0x70] sm:$0xff] }
 0x86b   :  { %v1469_v24 = vadd.f32 %v2651_v20, %v1468_v23  ;;  %v3208_v20 = vpack.c.bf16 %v2672_v19, %v2671_v18 }
 0x86d   :  { %v3196_v25 = vpack.c.bf16 %v1474_v22, %v1469_v24  ;;  %v2674_v22 = vld [vmem:[%s3930_s6 + $0x78] sm:$0xff]  ;;  %s3357_s6 = smov [#allocation2]  }
 0x86e   :  { %s2566_s21 = sshll.u32 %s3357_s6, 4  ;;  %s2567_s21 = int_to_ptr.vmem [resolvable:$true] %s2566_s21 }
 0x86f   :  { %3197 = vmatprep.subr.bf16.mxu0 %v3196_v25  ;;  %p3338_p1 = scmp.lt.s32.totalorder %s2567_s21, %s2567_s21 }
 0x870   :  { %3199 = vmatpush3.bf16.msra.mxu0 %v3196_v25  ;;  %v3212_v25 = vpack.c.bf16 %v2674_v22, %v2673_v21 }
 0x871   :  { %3201 = vmatprep.subr.bf16.mxu0 %v3200_v52 }
 0x937   :  { %v2969_v27 = vpop.f32.mrb[8].mxu1 }
 0x938   :  { %v1386_v28 = vadd.f32 %v2969_v27, %v2643_v26  ;;  %v1380_v29 = vpop.f32.mrb[9].mxu1 }
 0x939   :  { %v1381_v30 = vadd.f32 %v2643_v26, %v1380_v29  ;;  %v2668_v26 = vld [vmem:[%s3929_s5 + $0x3] ss:$0 sm:$0xff]  ;;  %s3333_s5 = scalar_lea.vmem %s2567_s21, 256 }
 0x93a   :  { %p3334_p0 = scmp.ne.s32.totalorder %s2567_s21, %s3333_s5  ;;  %p3339_p2 = scmp.lt.s32.totalorder %s3333_s5, %s3333_s5 }
 0x93b   :  { %v3190_v31 = vpack.c.bf16 %v1386_v28, %v1381_v30 }
 0x93c   :  { %p3340_p3 = por %p3339_p2, %p3338_p1 }
 0x93d   :  { %3192 = vmatprep.subr.msk.bf16.mxu1 %vm3550_vm2, %v3190_v31 }
 0x93e   :  { %3195 = vmatpush3.bf16.xpose.msk.msra.mxu1 %vm3550_vm2, %v3190_v31  ;;  %v2684_v31 = vld [vmem:[%s3933_s9 + $0x3] ss:$0 sm:$0xff]  ;;  %p3341_p4 = pnand %p3340_p3, %p3334_p0 }
 0x93f   :  { %2995 = vmatprep.subr.mxu1 %v2660_v53 }
 0x945   :  { %2986 = vmatmul.mubr.msk.f32.vlgmr.msra.gmra.mrb[10].mxu1 %vm386_vm1, %v1298_v17  ;;  %v3220_v17 = vpack.c.bf16 %v2682_v16, %v2681_v13 }
 0x946   :  { %2996 = vmatpush3.msra.mxu1 %v2660_v53 }
 0x947   :  { %3209 = vmatprep.subr.bf16.mxu1 %v3208_v20 }
 0xa18   :  { %v2987_v32 = vpop.f32.mrb[10].mxu1 }
 0xa19   :  { %v1561_v33 = vadd.f32 %v2987_v32, %v3575_v14  ;;  %v1555_v34 = vpop.f32.mrb[11].mxu1 }
 0xa1a   :  { %v1556_v35 = vadd.f32 %v1555_v34, %v3580_v15 }
 0xa1b   :  { %v1567_v36 = vsel %vm474_vm3, %v1561_v33, -inf }
 0xa1c   :  { %1568 = vmax.xlane.f32.xlu1 %v1567_v36  ;;  %v1564_v37 = vsel %vm474_vm3, %v1556_v35, -inf  ;;  %v2676_v36 = vld [vmem:[%s3931_s7 + $0x3] ss:$0 sm:$0xff] }
 0xa1d   :  { %1565 = vmax.xlane.f32.xlu0 %v1564_v37 }
 0xaa9   :  { %v1569_v38 = vpop.xlane.xlu1 %1568 }
 0xaaa   :  { %v1571_v40 = vsub.f32 %v1561_v33, %v1569_v38  ;;  %v1566_v41 = vpop.xlane.xlu0 %1565 }
 0xaab   :  { %v1570_v42 = vsub.f32 %v1556_v35, %v1566_v41 }
 0xaac   :  { %v1574_v43 = vmul.f32 1.442695, %v1571_v40 }
 0xaad   :  { %v1572_v45 = vmul.f32 1.442695, %v1570_v42 }
 0xaae   :  { %3305 = vpow2.f32 %v1574_v43 }
 0xaaf   :  { %3307 = vpow2.f32 %v1572_v45 }
 0xab8   :  { %v3306_v46 = vpop.eup %3305 }
 0xab9   :  { %v3308_v47 = vpop.eup %3307  ;;  %v1579_v48 = vsel %vm474_vm3, %v3306_v46, 0.0 }
 0xaba   :  { %1580 = vadd.xlane.f32.xlu1 %v1579_v48  ;;  %v1576_v49 = vsel %vm474_vm3, %v3308_v47, 0.0 }
 0xabb   :  { %1577 = vadd.xlane.f32.xlu0 %v1576_v49 }
 0xb47   :  { %v1581_v54 = vpop.xlane.xlu1 %1580 }
 0xb48   :  { %3309 = vrcp.f32 %v1581_v54  ;;  %v1578_v55 = vpop.xlane.xlu0 %1577 }
 0xb49   :  { %3311 = vrcp.f32 %v1578_v55 }
 0xb52   :  { %v3310_v56 = vpop.eup %3309 }
 0xb53   :  { %v3312_v57 = vpop.eup %3311  ;;  %v1585_v58 = vmul.f32 %v3310_v56, %v1581_v54 }
 0xb54   :  { %v1584_v59 = vmul.f32 %v3312_v57, %v1578_v55 }
 0xb55   :  { %v1587_v60 = vsub.f32 2.0, %v1585_v58 }
 0xb56   :  { %v1586_v61 = vsub.f32 2.0, %v1584_v59 }
 0xb57   :  { %v1589_v62 = vmul.f32 %v3310_v56, %v1587_v60  ;;  %v2693_v56 = vld [vmem:[%s3934_s10 + $0x18] sm:$0xff] }
 0xb58   :  { %v1588_v2 = vmul.f32 %v3312_v57, %v1586_v61 }
 0xb59   :  { %v1591_v8 = vmul.f32 %v3306_v46, %v1589_v62 }
 0xb5a   :  { %v1590_v5 = vmul.f32 %v3308_v47, %v1588_v2 }
 0xb5c   :  { %2992 = vmatprep.mubr.msk.f32.mxu0 %vm474_vm3, %v1590_v5 }
 0xb5d   :  { %2993 = vmatmul.mubr.msk.f32.vlgmr.msra.gmra.mrb[20].mxu0 %vm474_vm3, %v1591_v8 }
 0xb5e   :  { %3203 = vmatpush3.bf16.msra.mxu0 %v3200_v52  ;;  %3008 = vmatprep.mubr.msk.f32.mxu0 %vm62_vm0, %v3501_v39 }
 0xb5f   :  { %3205 = vmatprep.subr.bf16.mxu0 %v3204_v9 }
 0xb62   :  { %3207 = vmatpush3.bf16.msra.mxu0 %v3204_v9 }
 0xb63   :  { %3217 = vmatprep.subr.bf16.mxu0 %v3216_v12 }
 0xb65   :  { %3009 = vmatmul.mubr.msk.f32.vlgmr.msra.gmra.mrb[22].mxu0 %vm62_vm0, %v3511_v44 }
 0xb66   :  { %3219 = vmatpush3.bf16.msra.mxu0 %v3216_v12  ;;  %3030 = vmatprep.mubr.msk.f32.mxu0 %vm62_vm0, %v3501_v39  ;;  %v2579_v12 = vld [vmem:[%s3935_s11] ss:$0 sm:$0xff] }
 0xb67   :  { %3221 = vmatprep.subr.bf16.mxu0 %v3220_v17  ;;  %v121_v13 = vadd.f32 %v2579_v12, %v3463_v1  ;;  %v120_v16 = vadd.f32 %v2579_v12, %v3458_v0 }
 0xb69   :  { %v666_v18 = vadd.f32 %v3636_v7, %v120_v16  ;;  %v2472_v16 = vld [vmem:[%s3940_s16 + $0x68] sm:$0xff] }
 0xb6a   :  { %3223 = vmatpush3.bf16.msra.mxu0 %v3220_v17  ;;  %v667_v17 = vadd.f32 %v3634_v6, %v121_v13  ;;  %v2471_v13 = vld [vmem:[%s3940_s16 + $0x60] sm:$0xff] }
 0xb6d   :  { %3031 = vmatmul.mubr.msk.f32.vlgmr.msra.gmra.mrb[24].mxu0 %vm62_vm0, %v3511_v44 }
 0xc30   :  { %v2994_v23 = vpop.f32.mrb[20].mxu0 }
 0xc31   :  { %v1664_v24 = vpop.f32.mrb[21].mxu0 }
 0xc32   :  { %2997 = vmatprep.mubr.msk.f32.mxu1 %vm386_vm1, %v1664_v24 }
 0xc33   :  { %2998 = vmatmul.mubr.msk.f32.vlgmr.msra.gmra.mrb[6].mxu1 %vm386_vm1, %v2994_v23 }
 0xc34   :  { %3211 = vmatpush3.bf16.msra.mxu1 %v3208_v20  ;;  %3019 = vmatprep.mubr.msk.f32.mxu1 %vm62_vm0, %v3501_v39 }
 0xc35   :  { %3213 = vmatprep.subr.bf16.mxu1 %v3212_v25 }
 0xc38   :  { %v3010_v27 = vpop.f32.mrb[22].mxu0  ;;  %3215 = vmatpush3.bf16.msra.mxu1 %v3212_v25  ;;  %v2351_v25 = vld [vmem:[%s3938_s14] sm:$0xff] }
 0xc39   :  { %v1843_v28 = vadd.f32 %v3010_v27, %v2668_v26  ;;  %v1837_v29 = vpop.f32.mrb[23].mxu0  ;;  %v2353_v27 = vld [vmem:[%s3938_s14 + $0x10] sm:$0xff] }
 0xc3a   :  { %v1838_v30 = vadd.f32 %v2668_v26, %v1837_v29  ;;  %v2352_v26 = vld [vmem:[%s3938_s14 + $0x8] sm:$0xff]  ;;  %v2354_v29 = vld [vmem:[%s3938_s14 + $0x18] sm:$0xff] }
 0xc3b   :  { %3020 = vmatmul.mubr.msk.f32.vlgmr.msra.gmra.mrb[12].mxu1 %vm62_vm0, %v3511_v44 }
 0xc3c   :  { %3037 = vmatprep.mubr.msk.f32.mxu1 %vm386_vm1, %v1838_v30  ;;  %v3238_v30 = vpack.c.bf16 %v2354_v29, %v2353_v27 }
 0xc40   :  { %v3032_v39 = vpop.f32.mrb[24].mxu0 }
 0xc41   :  { %v2019_v32 = vadd.f32 %v3032_v39, %v2684_v31  ;;  %v2013_v33 = vpop.f32.mrb[25].mxu0 }
 0xc42   :  { %v2014_v34 = vadd.f32 %v2684_v31, %v2013_v33 }
 0xc44   :  { %v3230_v35 = vpack.c.bf16 %v2019_v32, %v2014_v34 }
 0xc46   :  { %3231 = vmatprep.subr.bf16.mxu0 %v3230_v35 }
 0xc47   :  { %3233 = vmatpush3.bf16.msra.mxu0 %v3230_v35 }
 0xd0e   :  { %v3021_v37 = vpop.f32.mrb[12].mxu1 }
 0xd0f   :  { %v1931_v38 = vadd.f32 %v3021_v37, %v2676_v36  ;;  %v1925_v44 = vpop.f32.mrb[13].mxu1 }
 0xd10   :  { %v1926_v40 = vadd.f32 %v2676_v36, %v1925_v44 }
 0xd12   :  { %v3224_v41 = vpack.c.bf16 %v1931_v38, %v1926_v40 }
 0xd14   :  { %3226 = vmatprep.subr.msk.bf16.mxu1 %vm3550_vm2, %v3224_v41 }
 0xd15   :  { %3229 = vmatpush3.bf16.xpose.msk.msra.mxu1 %vm3550_vm2, %v3224_v41 }
 0xd16   :  { %3047 = vmatprep.subr.mxu1 %v2693_v56 }
 0xd1c   :  { %3038 = vmatmul.mubr.msk.f32.vlgmr.msra.gmra.mrb[14].mxu1 %vm386_vm1, %v1843_v28  ;;  %v3234_v28 = vpack.c.bf16 %v2352_v26, %v2351_v25 }
 0xd1d   :  { %3048 = vmatpush3.msra.mxu1 %v2693_v56 }
 0xd1e   :  { %3235 = vmatprep.subr.bf16.mxu0 %v3234_v28 }
 0xdef   :  { %v3039_v42 = vpop.f32.mrb[14].mxu1 }
 0xdf0   :  { %v2106_v43 = vadd.f32 %v3039_v42, %v3575_v14  ;;  %v2100_v45 = vpop.f32.mrb[15].mxu1 }
 0xdf1   :  { %v2101_v46 = vadd.f32 %v2100_v45, %v3580_v15 }
 0xdf2   :  { %v2112_v47 = vsel %vm474_vm3, %v2106_v43, -inf }
 0xdf3   :  { %2113 = vmax.xlane.f32.xlu1 %v2112_v47  ;;  %v2109_v48 = vsel %vm474_vm3, %v2101_v46, -inf }
 0xdf4   :  { %2110 = vmax.xlane.f32.xlu0 %v2109_v48  ;;  %v2696_v48 = vld [vmem:[%s3936_s12] ss:$0 sm:$0xff] }
 0xe80   :  { %v2114_v49 = vpop.xlane.xlu1 %2113 }
 0xe81   :  { %v2116_v50 = vsub.f32 %v2106_v43, %v2114_v49  ;;  %v2111_v51 = vpop.xlane.xlu0 %2110 }
 0xe82   :  { %v2115_v52 = vsub.f32 %v2101_v46, %v2111_v51 }
 0xe83   :  { %v2119_v63 = vmul.f32 1.442695, %v2116_v50 }
 0xe84   :  { %v2117_v53 = vmul.f32 1.442695, %v2115_v52 }
 0xe85   :  { %3313 = vpow2.f32 %v2119_v63  ;;  %v2697_v63 = vld [vmem:[%s3937_s13] ss:$0 sm:$0xff] }
 0xe86   :  { %3315 = vpow2.f32 %v2117_v53 }
 0xe8f   :  { %v3314_v54 = vpop.eup %3313 }
 0xe90   :  { %v3316_v55 = vpop.eup %3315  ;;  %v2124_v14 = vsel %vm474_vm3, %v3314_v54, 0.0 }
 0xe91   :  { %2125 = vadd.xlane.f32.xlu1 %v2124_v14  ;;  %v2121_v15 = vsel %vm474_vm3, %v3316_v55, 0.0  ;;  %v2459_v14 = vld [vmem:[%s3940_s16] sm:$0xff] }
 0xe92   :  { %2122 = vadd.xlane.f32.xlu0 %v2121_v15  ;;  %v2460_v15 = vld [vmem:[%s3940_s16 + $0x8] sm:$0xff] }
 0xe93   :  { %v3242_v56 = vpack.c.bf16 %v2460_v15, %v2459_v14 }
 0xe95   :  { %3243 = vmatprep.subr.bf16.mxu1 %v3242_v56 }
 0xf1e   :  { %v2126_v57 = vpop.xlane.xlu1 %2125 }
 0xf1f   :  { %3317 = vrcp.f32 %v2126_v57  ;;  %v2123_v58 = vpop.xlane.xlu0 %2122 }
 0xf20   :  { %3319 = vrcp.f32 %v2123_v58 }
 0xf29   :  { %v3318_v59 = vpop.eup %3317 }
 0xf2a   :  { %v3320_v60 = vpop.eup %3319  ;;  %v2130_v61 = vmul.f32 %v3318_v59, %v2126_v57  ;;  %v2461_v57 = vld [vmem:[%s3940_s16 + $0x10] sm:$0xff] }
 0xf2b   :  { %v2129_v62 = vmul.f32 %v3320_v60, %v2123_v58  ;;  %v2462_v58 = vld [vmem:[%s3940_s16 + $0x18] sm:$0xff] }
 0xf2c   :  { %v2132_v2 = vsub.f32 2.0, %v2130_v61  ;;  %v2464_v61 = vld [vmem:[%s3940_s16 + $0x28] sm:$0xff] }
 0xf2d   :  { %v2131_v3 = vsub.f32 2.0, %v2129_v62 }
 0xf2e   :  { %v2134_v4 = vmul.f32 %v3318_v59, %v2132_v2  ;;  %v3246_v59 = vpack.c.bf16 %v2462_v58, %v2461_v57  ;;  %v2465_v2 = vld [vmem:[%s3940_s16 + $0x30] sm:$0xff] }
 0xf2f   :  { %v2133_v5 = vmul.f32 %v3320_v60, %v2131_v3  ;;  %v2463_v60 = vld [vmem:[%s3940_s16 + $0x20] sm:$0xff]  ;;  %v2466_v3 = vld [vmem:[%s3940_s16 + $0x38] sm:$0xff] }
 0xf30   :  { %v2136_v9 = vmul.f32 %v3314_v54, %v2134_v4  ;;  %v3250_v62 = vpack.c.bf16 %v2464_v61, %v2463_v60  ;;  %v3254_v4 = vpack.c.bf16 %v2466_v3, %v2465_v2 }
 0xf31   :  { %v2135_v8 = vmul.f32 %v3316_v55, %v2133_v5  ;;  %v2467_v5 = vld [vmem:[%s3940_s16 + $0x40] sm:$0xff] }
 0xf33   :  { %3044 = vmatprep.mubr.msk.f32.mxu0 %vm474_vm3, %v2135_v8  ;;  %v2468_v8 = vld [vmem:[%s3940_s16 + $0x48] sm:$0xff] }
 0xf34   :  { %3045 = vmatmul.mubr.msk.f32.vlgmr.msra.gmra.mrb[26].mxu0 %vm474_vm3, %v2136_v9  ;;  %v3258_v9 = vpack.c.bf16 %v2468_v8, %v2467_v5 }
 0xf35   :  { %3237 = vmatpush3.bf16.msra.mxu0 %v3234_v28 }
 0xf36   :  { %3239 = vmatprep.subr.bf16.mxu0 %v3238_v30 }
 0xf39   :  { %3241 = vmatpush3.bf16.msra.mxu0 %v3238_v30 }
0x1007   :  { %v3046_v10 = vpop.f32.mrb[26].mxu0 }
0x1008   :  { %v2209_v11 = vpop.f32.mrb[27].mxu0 }
0x1009   :  { %3049 = vmatprep.mubr.msk.f32.mxu1 %vm386_vm1, %v2209_v11  ;;  %v2470_v11 = vld [vmem:[%s3940_s16 + $0x58] sm:$0xff] }
0x100a   :  { %3050 = vmatmul.mubr.msk.f32.vlgmr.msra.gmra.mrb[6].mxu1 %vm386_vm1, %v3046_v10  ;;  %v2469_v10 = vld [vmem:[%s3940_s16 + $0x50] sm:$0xff] }
0x100b   :  { %3245 = vmatpush3.bf16.msra.mxu1 %v3242_v56  ;;  %v3262_v12 = vpack.c.bf16 %v2470_v11, %v2469_v10 }
0x100c   :  { %3247 = vmatprep.subr.bf16.mxu1 %v3246_v59 }
0x100f   :  { %3249 = vmatpush3.bf16.msra.mxu1 %v3246_v59 }
0x1010   :  { %3251 = vmatprep.subr.bf16.mxu1 %v3250_v62 }
0x1013   :  { %3253 = vmatpush3.bf16.msra.mxu1 %v3250_v62 }
0x1014   :  { %3255 = vmatprep.subr.bf16.mxu1 %v3254_v4 }
0x1017   :  { %3257 = vmatpush3.bf16.msra.mxu1 %v3254_v4 }
0x1018   :  { %3259 = vmatprep.subr.bf16.mxu1 %v3258_v9 }
0x101b   :  { %3261 = vmatpush3.bf16.msra.mxu1 %v3258_v9 }
0x101c   :  { %3263 = vmatprep.subr.bf16.mxu1 %v3262_v12 }
0x101f   :  { %3265 = vmatpush3.bf16.msra.mxu1 %v3262_v12 }
0x10dd   :  { %v3051_v19 = vpop.f32.mrb[6].mxu1 }
0x10de   :  { %v3818_v20 = vadd.f32 %v3051_v19, %v667_v17  ;;  %v2292_v21 = vpop.f32.mrb[7].mxu1  ;;  %v3266_v17 = vpack.c.bf16 %v2472_v16, %v2471_v13  ;;  %v2474_v19 = vld [vmem:[%s3940_s16 + $0x78] sm:$0xff] }
0x10df   :  { %v3820_v22 = vadd.f32 %v2292_v21, %v666_v18  ;;  %v2473_v18 = vld [vmem:[%s3940_s16 + $0x70] sm:$0xff] }
0x10e0   :  { %v2306_v23 = vsel %vm62_vm0, %v3818_v20, 0.0  ;;  %v2312_v24 = vmul.f32 %v3818_v20, %v3818_v20  ;;  %3267 = vmatprep.subr.bf16.mxu1 %v3266_v17  ;;  %v3270_v21 = vpack.c.bf16 %v2474_v19, %v2473_v18 }
0x10e1   :  { %2307 = vadd.xlane.f32.xlu1 %v2306_v23  ;;  %v2303_v0 = vsel %vm62_vm0, %v3820_v22, 0.0  ;;  %v2311_v1 = vmul.f32 %v3820_v22, %v3820_v22  ;;  %3269 = vmatpush3.bf16.msra.mxu1 %v3266_v17  ;;  %v2698_v23 = vld [vmem:[%s3939_s15] ss:$0 sm:$0xff] }
0x10e2   :  { %2304 = vadd.xlane.f32.xlu0 %v2303_v0  ;;  %v2316_v6 = vsel %vm62_vm0, %v2312_v24, 0.0  ;;  %3271 = vmatprep.subr.bf16.mxu1 %v3270_v21 }
0x10e3   :  { %v2313_v7 = vsel %vm62_vm0, %v2311_v1, 0.0 }
0x10e5   :  { %2317 = vadd.xlane.f32.xlu1 %v2316_v6  ;;  %3273 = vmatpush3.bf16.msra.mxu1 %v3270_v21 }
0x10e6   :  { %2314 = vadd.xlane.f32.xlu0 %v2313_v7 }
0x116e   :  { %v2308_v31 = vpop.xlane.xlu1 %2307 }
0x116f   :  { %v2310_v39 = vmul.f32 0.03125, %v2308_v31  ;;  %v2305_v32 = vpop.xlane.xlu0 %2304 }
0x1170   :  { %v2309_v33 = vmul.f32 0.03125, %v2305_v32 }
0x1171   :  { %v2322_v35 = vmul.f32 %v2310_v39, %v2310_v39  ;;  %v2326_v45 = vsub.f32 %v3818_v20, %v2310_v39 }
0x1172   :  { %v2318_v34 = vpop.xlane.xlu1 %2317  ;;  %v2321_v38 = vmul.f32 %v2309_v33, %v2309_v33  ;;  %v2325_v47 = vsub.f32 %v3820_v22, %v2309_v33 }
0x1173   :  { %v2320_v36 = vmul.f32 0.03125, %v2318_v34  ;;  %v2315_v37 = vpop.xlane.xlu0 %2314 }
0x1174   :  { %v2319_v44 = vmul.f32 0.03125, %v2315_v37 }
0x1175   :  { %v2324_v40 = vsub.f32 %v2320_v36, %v2322_v35  ;;  %v2703_v35 = vld [vmem:[%s3941_s17] ss:$0 sm:$0xff] }
0x1176   :  { %v2323_v41 = vsub.f32 %v2319_v44, %v2321_v38 }
0x1177   :  { %v2328_v42 = vadd.f32 1e-05, %v2324_v40 }
0x1178   :  { %v2327_v43 = vadd.f32 1e-05, %v2323_v41 }
0x1179   :  { %3321 = vrsqrt.f32 %v2328_v42 }
0x117a   :  { %3323 = vrsqrt.f32 %v2327_v43 }
0x1183   :  { %v3322_v46 = vpop.eup %3321 }
0x1184   :  { %v3324_v49 = vpop.eup %3323  ;;  %v2332_v50 = vmul.f32 %v3322_v46, %v2326_v45 }
0x1185   :  { %v2331_v51 = vmul.f32 %v3324_v49, %v2325_v47 }
0x1186   :  { %v2341_v52 = vmul.f32 %v2696_v48, %v2332_v50 }
0x1187   :  { %v2340_v53 = vmul.f32 %v2696_v48, %v2331_v51 }
0x1188   :  { %v2350_v55 = vadd.f32 %v2697_v63, %v2341_v52 }
0x1189   :  { %v2349_v54 = vadd.f32 %v2697_v63, %v2340_v53 }
0x118b   :  { %3060 = vmatprep.mubr.msk.f32.mxu0 %vm62_vm0, %v2349_v54 }
0x118c   :  { %3061 = vmatmul.mubr.msk.f32.vlgmr.msra.gmra.mrb[28].mxu0 %vm62_vm0, %v2350_v55 }
0x125f   :  { %v3062_v24 = vpop.f32.mrb[28].mxu0 }
0x1260   :  { %v2440_v0 = vadd.f32 %v3062_v24, %v2698_v23  ;;  %v2434_v1 = vpop.f32.mrb[29].mxu0 }
0x1261   :  { %v2435_v6 = vadd.f32 %v2698_v23, %v2434_v1 }
0x1262   :  { %v2702_v7 = vmul.f32 -1.702, %v2440_v0 }
0x1263   :  { %v2701_v25 = vmul.f32 -1.702, %v2435_v6 }
0x1264   :  { %v2449_v26 = vmul.f32 1.442695, %v2702_v7 }
0x1265   :  { %v2447_v27 = vmul.f32 1.442695, %v2701_v25 }
0x1266   :  { %3325 = vpow2.f32 %v2449_v26 }
0x1267   :  { %3327 = vpow2.f32 %v2447_v27 }
0x1270   :  { %v3326_v28 = vpop.eup %3325 }
0x1271   :  { %v3328_v29 = vpop.eup %3327  ;;  %v2452_v30 = vadd.f32 1.0, %v3326_v28 }
0x1272   :  { %v2451_v31 = vadd.f32 1.0, %v3328_v29 }
0x1273   :  { %3329 = vrcp.f32 %v2452_v30 }
0x1274   :  { %3331 = vrcp.f32 %v2451_v31 }
0x127d   :  { %v3330_v39 = vpop.eup %3329 }
0x127e   :  { %v3332_v32 = vpop.eup %3331  ;;  %v2458_v34 = vmul.f32 %v3330_v39, %v2440_v0 }
0x127f   :  { %v2457_v33 = vmul.f32 %v3332_v32, %v2435_v6 }
0x1281   :  { %3095 = vmatprep.mubr.f32.mxu1 %v2457_v33 }
0x1282   :  { %3096 = vmatmul.mubr.f32.vlgmr.msra.gmra.mrb[16].mxu1 %v2458_v34 }
0x1355   :  { %v3097_v36 = vpop.f32.mrb[16].mxu1 }
0x1356   :  { %v2554_v37 = vadd.f32 %v3097_v36, %v2703_v35  ;;  %v2548_v38 = vpop.f32.mrb[17].mxu1 }
0x1357   :  { %v2549_v44 = vadd.f32 %v2703_v35, %v2548_v38 }
0x1358   :  { %v2558_v40 = vadd.f32 %v3818_v20, %v2554_v37 }
0x1359   :  { %v2557_v41 = vadd.f32 %v3820_v22, %v2549_v44 }
0x135a   :  { %2560 = vst.msk [vmem:[#allocation2 + $0x8] sm:$0xff] %vm62_vm0, %v2558_v40 }
0x135b   :  { %2559 = vst.msk [vmem:[#allocation2] sm:$0xff] %vm62_vm0, %v2557_v41 }
0x135c   :  { %3344 = shalt.err (!%p3341_p4)
}
0x135d   :  { %s3345_s7 = scalar_lea.hbm %s3942_s18, 256 }
0x135e   :  { %p3346_p5 = scmp.ne.s32.totalorder %s3942_s18, %s3345_s7  ;;  %p3349_p6 = scmp.lt.u32.totalorder %s3345_s7, %s3942_s18 }
0x1360   :  { %p3351_p7 = pnand %p3349_p6, %p3346_p5 }
0x1362   :  { %3354 = shalt.err (!%p3351_p7)
}
0x1363   :  { %s3358_s3 = smov 128   ;;  %s3359_s4 = smov 8  }
0x1364   :  { %2572 = dma.vmem_to_hbm [thread:$0]  %s2567_s21, 256, %s3942_s18, [#allocation3], %s3358_s3, %s3358_s3, %s3359_s4  }
0x1365   :  { %3355 = dma.done.wait [#allocation3], 256  }
0x1366   :  { %3356 = vsyncadd [#allocation3], 4294967040 }
0x1367   :  { %2576 = vsyncpa [#allocation3], 1 }

</bundles_post_ra>
